<compile_context>
chip_gen: v5e
topology: v5e:2x2
jax: 0.10.0
libtpu: 0.0.40
codegen_flags: <defaults>
</compile_context>

<pallas_src>
import functools
import math

import jax
import jax.numpy as jnp
from jax import lax
from jax.experimental import pallas as pl
from jax.experimental.pallas import tpu as pltpu


# ---------------------------------------------------------------------------
# Fused per-leaf-graph forward kernel (one grid step == one leaf graph)
# ---------------------------------------------------------------------------
def _san_leaf_kernel(feats_ref, probs_ref, adj_ref, *refs,
                     n_pe, n_gt, n_mlp, gamma, residual, use_ln):
    it = iter(refs)
    emb_w = next(it); emb_b = next(it)
    pe_params = [(next(it), next(it)) for _ in range(n_pe)]
    gt_params = []
    for _ in range(n_gt):
        gt_params.append(dict(
            wq=next(it), wk=next(it), wv=next(it), wo=next(it), bo=next(it),
            ln1_g=next(it), ln1_b=next(it),
            ffn_w1=next(it), ffn_b1=next(it),
            ffn_w2=next(it), ffn_b2=next(it),
            ln2_g=next(it), ln2_b=next(it)))
    mlp_params = [(next(it), next(it)) for _ in range(n_mlp)]
    leaf_out_ref = next(it)
    pooled_ref = next(it)

    def linear(x, w_ref, b_ref, relu=False):
        y = jnp.dot(x, w_ref[...], preferred_element_type=jnp.float32) + b_ref[...]
        return jnp.maximum(y, 0.0) if relu else y

    def layer_norm(x, g_ref, b_ref, eps=1e-5):
        mu = jnp.mean(x, axis=-1, keepdims=True)
        var = jnp.mean((x - mu) ** 2, axis=-1, keepdims=True)
        return (x - mu) * lax.rsqrt(var + eps) * g_ref[...] + b_ref[...]

    feats = feats_ref[0]          # [N, in_dim]
    probs = probs_ref[0]          # [N, num_rw_steps]
    adj = adj_ref[0]              # [N, N]  (1.0 = real edge incl. self loop)

    # embedding_h + pe_encoder (ReLU after every PE layer, as in reference)
    h = linear(feats, emb_w, emb_b)
    pe = probs
    for (w, b) in pe_params:
        pe = linear(pe, w, b, relu=True)
    h = jnp.concatenate([h, pe], axis=-1)        # [N, hidden]
    # in_feat_dropout(p=0) -> identity (eval mode)

    n = h.shape[0]
    for lp in gt_params:
        heads = lp["wq"].shape[0]
        head_dim = lp["wq"].shape[2]
        scale = 1.0 / math.sqrt(head_dim)

        h_in1 = h
        hb = jnp.broadcast_to(h[None], (heads, n, h.shape[-1]))   # [H,N,D]
        q = jnp.einsum("hnd,hdk->hnk", hb, lp["wq"][...],
                       preferred_element_type=jnp.float32)        # [H,N,hd]
        k = jnp.einsum("hnd,hdk->hnk", hb, lp["wk"][...],
                       preferred_element_type=jnp.float32)
        v = jnp.einsum("hnd,hdk->hnk", hb, lp["wv"][...],
                       preferred_element_type=jnp.float32)

        s = jnp.einsum("hnk,hmk->hnm", q, k,
                       preferred_element_type=jnp.float32) * scale  # [H,N,N]
        adj_b = jnp.broadcast_to(adj[None] > 0.0, s.shape)
        # single exp: real edges use s/(1+g), fake edges g*s/(1+g)
        s_eff = jnp.where(adj_b, s, gamma * s) * (1.0 / (1.0 + gamma))
        w_att = jnp.exp(jnp.clip(s_eff, -5.0, 5.0))
        z = jnp.sum(w_att, axis=-1, keepdims=True) + 1e-6
        attn = jnp.einsum("hnm,hmk->hnk", w_att, v,
                          preferred_element_type=jnp.float32)
        attn = attn * pl.reciprocal(z, approx=True)               # [H,N,hd]

        # output projection: concat over heads @ W_O  ==  sum_h attn[h] @ W_O[h]
        out = lp["bo"][...]
        for hd in range(heads):
            out = out + jnp.dot(attn[hd], lp["wo"][hd],
                                preferred_element_type=jnp.float32)
        h = out
        if residual:
            h = h_in1 + h
        if use_ln:
            h = layer_norm(h, lp["ln1_g"], lp["ln1_b"])
        h_in2 = h
        h = linear(h, lp["ffn_w1"], lp["ffn_b1"], relu=True)
        h = linear(h, lp["ffn_w2"], lp["ffn_b2"], relu=False)
        if residual:
            h = h_in2 + h
        if use_ln:
            h = layer_norm(h, lp["ln2_g"], lp["ln2_b"])

    # MLP_layer_hierarchical (MLPReadout: ReLU on hidden layers, final linear)
    for i, (w, b) in enumerate(mlp_params):
        h = linear(h, w, b, relu=(i < n_mlp - 1))

    leaf_out_ref[0] = h.astype(leaf_out_ref.dtype)
    pooled_ref[0] = jnp.mean(h, axis=0, keepdims=True).astype(pooled_ref.dtype)


# ---------------------------------------------------------------------------
# Wrapper: one pallas_call, grid over leaf graphs, weights resident in VMEM
# ---------------------------------------------------------------------------
def _flatten_params(params):
    flat = [params["emb_h_w"], params["emb_h_b"]]
    for (w, b) in params["pe_encoder"]:
        flat += [w, b]
    for lp in params["gt_layers"]:
        flat += [lp["wq"], lp["wk"], lp["wv"], lp["wo"], lp["bo"],
                 lp["ln1_g"], lp["ln1_b"],
                 lp["ffn_w1"], lp["ffn_b1"], lp["ffn_w2"], lp["ffn_b2"],
                 lp["ln2_g"], lp["ln2_b"]]
    for (w, b) in params["mlp_hier"]:
        flat += [w, b]
    return flat


@functools.partial(jax.jit, static_argnames=("gamma", "residual", "use_ln"))
def san_leaf_batch_forward(params, feats, probs, adjs, *, gamma, residual, use_ln):
    G, N, _ = feats.shape
    hidden = params["mlp_hier"][-1][0].shape[1]
    flat_w = _flatten_params(params)

    def _data_spec(a):
        nd = a.ndim
        return pl.BlockSpec((1,) + a.shape[1:],
                            lambda g, _nd=nd: (g,) + (0,) * (_nd - 1))

    def _w_spec(a):
        zeros = (0,) * a.ndim
        return pl.BlockSpec(a.shape, lambda g, _z=zeros: _z)

    in_specs = [_data_spec(feats), _data_spec(probs), _data_spec(adjs)]
    in_specs += [_w_spec(a) for a in flat_w]

    kernel = functools.partial(
        _san_leaf_kernel,
        n_pe=len(params["pe_encoder"]),
        n_gt=len(params["gt_layers"]),
        n_mlp=len(params["mlp_hier"]),
        gamma=gamma, residual=residual, use_ln=use_ln)

    out_shape = (jax.ShapeDtypeStruct((G, N, hidden), jnp.float32),
                 jax.ShapeDtypeStruct((G, 1, hidden), jnp.float32))
    out_specs = [pl.BlockSpec((1, N, hidden), lambda g: (g, 0, 0)),
                 pl.BlockSpec((1, 1, hidden), lambda g: (g, 0, 0))]

    leaf_out, pooled = pl.pallas_call(
        kernel,
        out_shape=out_shape,
        grid=(G,),
        in_specs=in_specs,
        out_specs=out_specs,
        compiler_params=pltpu.CompilerParams(
            dimension_semantics=("parallel",)),
    )(feats, probs, adjs, *flat_w)
    return leaf_out, pooled


def san_hierarchical_forward(params, cfg, feats, probs, adjs, node_ids, num_nodes):
    leaf_out, pooled = san_leaf_batch_forward(
        params, feats, probs, adjs,
        gamma=cfg["gamma"], residual=cfg["residual"], use_ln=cfg["layer_norm"])
    # `pooled` is the per-graph mean (the parent-graph node features in the
    # reference).  The reference's fuse_mlp(child ++ parent) output is
    # DISCARDED (child features are reassigned unchanged), so that dead work
    # is skipped here.
    # TODO(synk): DGL parents_dict/children_dict bookkeeping and the dead
    # eigenvector Transformer PE path are not reproduced (pure python glue /
    # commented-out in the reference forward).
    hidden = leaf_out.shape[-1]
    res = jnp.zeros((num_nodes, hidden), jnp.float32)
    res = res.at[node_ids.reshape(-1)].set(leaf_out.reshape(-1, hidden))
    return res


# ---------------------------------------------------------------------------
# Parameter init (PyTorch nn.Linear-style uniform init; QKV/O pre-split per head)
# ---------------------------------------------------------------------------
def init_linear(key, din, dout, bias=True):
    k1, k2 = jax.random.split(key)
    lim = 1.0 / math.sqrt(din)
    w = jax.random.uniform(k1, (din, dout), jnp.float32, -lim, lim)
    b = jax.random.uniform(k2, (1, dout), jnp.float32, -lim, lim) if bias \
        else jnp.zeros((1, dout), jnp.float32)
    return w, b


def init_params(key, cfg):
    hidden = cfg["GT_hidden_dim"]
    out_dim = cfg["GT_out_dim"]
    pe_dim = cfg["LPE_dim"]
    in_dim = cfg["in_dim"]
    heads = cfg["GT_n_heads"]
    keys = iter(jax.random.split(key, 64))
    p = {}

    # embedding_h: in_dim -> hidden - pe_dim
    p["emb_h_w"], p["emb_h_b"] = init_linear(next(keys), in_dim, hidden - pe_dim)

    # pe_encoder: num_rw_steps -> 2*pe -> [2*pe]*(n_layers-2) -> pe, ReLU all
    pe_dims = [cfg["num_rw_steps"], 2 * pe_dim] + \
              [2 * pe_dim] * (cfg["LPE_layers"] - 2) + [pe_dim]
    p["pe_encoder"] = [init_linear(next(keys), a, b)
                       for a, b in zip(pe_dims[:-1], pe_dims[1:])]

    # GraphTransformer layers
    p["gt_layers"] = []
    dims = [hidden] * (cfg["GT_layers"] - 1) + [out_dim]
    din = hidden
    for dout in dims:
        hd = dout // heads
        lp = {}
        wq, _ = init_linear(next(keys), din, dout, bias=False)
        wk, _ = init_linear(next(keys), din, dout, bias=False)
        wv, _ = init_linear(next(keys), din, dout, bias=False)
        wo, bo = init_linear(next(keys), dout, dout)
        # per-head layout so the kernel runs head-batched einsums with no
        # in-kernel reshapes/relayouts
        lp["wq"] = wq.reshape(din, heads, hd).transpose(1, 0, 2)   # [H, din, hd]
        lp["wk"] = wk.reshape(din, heads, hd).transpose(1, 0, 2)
        lp["wv"] = wv.reshape(din, heads, hd).transpose(1, 0, 2)
        lp["wo"] = wo.reshape(heads, hd, dout)                      # [H, hd, dout]
        lp["bo"] = bo
        lp["ln1_g"] = jnp.ones((1, dout), jnp.float32)
        lp["ln1_b"] = jnp.zeros((1, dout), jnp.float32)
        lp["ffn_w1"], lp["ffn_b1"] = init_linear(next(keys), dout, 2 * dout)
        lp["ffn_w2"], lp["ffn_b2"] = init_linear(next(keys), 2 * dout, dout)
        lp["ln2_g"] = jnp.ones((1, dout), jnp.float32)
        lp["ln2_b"] = jnp.zeros((1, dout), jnp.float32)
        p["gt_layers"].append(lp)
        din = dout

    # MLP_layer_hierarchical: MLPReadout(GT_out_dim, GT_hidden_dim), L=2
    p["mlp_hier"] = [
        init_linear(next(keys), out_dim, out_dim // 2),
        init_linear(next(keys), out_dim // 2, out_dim // 4),
        init_linear(next(keys), out_dim // 4, hidden),
    ]
    return p


# ---------------------------------------------------------------------------
# Main
# ---------------------------------------------------------------------------
if __name__ == "__main__":
    cfg = dict(
        in_dim=16,
        n_classes=7,
        gamma=0.1,
        LPE_layers=3,
        LPE_dim=8,
        LPE_n_heads=2,
        GT_layers=2,
        GT_hidden_dim=32,
        GT_out_dim=32,
        GT_n_heads=4,
        residual=True,
        layer_norm=True,
        batch_norm=False,
        num_rw_steps=5,
    )

    key = jax.random.PRNGKey(0)
    k_param, k_feat, k_prob = jax.random.split(key, 3)
    params = init_params(k_param, cfg)

    # synthetic 2-level hierarchy: 1 partition with 2 leaf graphs of 8 nodes
    num_leaf_graphs = 2
    nodes_per_graph = 8
    num_nodes = num_leaf_graphs * nodes_per_graph

    feats = jax.random.normal(
        k_feat, (num_leaf_graphs, nodes_per_graph, cfg["in_dim"]), jnp.float32)
    probs = jax.random.uniform(
        k_prob, (num_leaf_graphs, nodes_per_graph, cfg["num_rw_steps"]), jnp.float32)

    idx = jnp.arange(nodes_per_graph)
    ring_adj = (jnp.zeros((nodes_per_graph, nodes_per_graph), jnp.float32)
                .at[idx, idx].set(1.0)
                .at[idx, (idx + 1) % nodes_per_graph].set(1.0)
                .at[idx, (idx - 1) % nodes_per_graph].set(1.0))
    adjs = jnp.stack([ring_adj] * num_leaf_graphs)
    node_ids = jnp.arange(num_nodes).reshape(num_leaf_graphs, nodes_per_graph)

    res = san_hierarchical_forward(params, cfg, feats, probs, adjs,
                                   node_ids, num_nodes)
    res = jax.block_until_ready(res)
    assert res.shape == (num_nodes, cfg["GT_hidden_dim"]), res.shape
    assert bool(jnp.all(jnp.isfinite(res)))
    print("KERNEL_OK")
</pallas_src>

<mosaic_0001>
module attributes {stable_mosaic.version = 11 : i64} {
  func.func @_san_leaf_kernel(%arg0: i32, %arg1: memref<1x8x16xf32, #tpu.memory_space<vmem>>, %arg2: memref<1x8x5xf32, #tpu.memory_space<vmem>>, %arg3: memref<1x8x8xf32, #tpu.memory_space<vmem>>, %arg4: memref<16x24xf32, #tpu.memory_space<vmem>>, %arg5: memref<1x24xf32, #tpu.memory_space<vmem>>, %arg6: memref<5x16xf32, #tpu.memory_space<vmem>>, %arg7: memref<1x16xf32, #tpu.memory_space<vmem>>, %arg8: memref<16x16xf32, #tpu.memory_space<vmem>>, %arg9: memref<1x16xf32, #tpu.memory_space<vmem>>, %arg10: memref<16x8xf32, #tpu.memory_space<vmem>>, %arg11: memref<1x8xf32, #tpu.memory_space<vmem>>, %arg12: memref<4x32x8xf32, #tpu.memory_space<vmem>>, %arg13: memref<4x32x8xf32, #tpu.memory_space<vmem>>, %arg14: memref<4x32x8xf32, #tpu.memory_space<vmem>>, %arg15: memref<4x8x32xf32, #tpu.memory_space<vmem>>, %arg16: memref<1x32xf32, #tpu.memory_space<vmem>>, %arg17: memref<1x32xf32, #tpu.memory_space<vmem>>, %arg18: memref<1x32xf32, #tpu.memory_space<vmem>>, %arg19: memref<32x64xf32, #tpu.memory_space<vmem>>, %arg20: memref<1x64xf32, #tpu.memory_space<vmem>>, %arg21: memref<64x32xf32, #tpu.memory_space<vmem>>, %arg22: memref<1x32xf32, #tpu.memory_space<vmem>>, %arg23: memref<1x32xf32, #tpu.memory_space<vmem>>, %arg24: memref<1x32xf32, #tpu.memory_space<vmem>>, %arg25: memref<4x32x8xf32, #tpu.memory_space<vmem>>, %arg26: memref<4x32x8xf32, #tpu.memory_space<vmem>>, %arg27: memref<4x32x8xf32, #tpu.memory_space<vmem>>, %arg28: memref<4x8x32xf32, #tpu.memory_space<vmem>>, %arg29: memref<1x32xf32, #tpu.memory_space<vmem>>, %arg30: memref<1x32xf32, #tpu.memory_space<vmem>>, %arg31: memref<1x32xf32, #tpu.memory_space<vmem>>, %arg32: memref<32x64xf32, #tpu.memory_space<vmem>>, %arg33: memref<1x64xf32, #tpu.memory_space<vmem>>, %arg34: memref<64x32xf32, #tpu.memory_space<vmem>>, %arg35: memref<1x32xf32, #tpu.memory_space<vmem>>, %arg36: memref<1x32xf32, #tpu.memory_space<vmem>>, %arg37: memref<1x32xf32, #tpu.memory_space<vmem>>, %arg38: memref<32x16xf32, #tpu.memory_space<vmem>>, %arg39: memref<1x16xf32, #tpu.memory_space<vmem>>, %arg40: memref<16x8xf32, #tpu.memory_space<vmem>>, %arg41: memref<1x8xf32, #tpu.memory_space<vmem>>, %arg42: memref<8x32xf32, #tpu.memory_space<vmem>>, %arg43: memref<1x32xf32, #tpu.memory_space<vmem>>, %arg44: memref<1x8x32xf32, #tpu.memory_space<vmem>>, %arg45: memref<1x1x32xf32, #tpu.memory_space<vmem>>) attributes {dimension_semantics = [#tpu.dimension_semantics<parallel>], iteration_bounds = array<i64: 2>, scalar_prefetch = 0 : i64, scratch_operands = 0 : i64, tpu.core_type = #tpu.core_type<tc>, window_params = [{transform_indices = @transform_0, window_bounds = array<i64: 1, 8, 16>}, {transform_indices = @transform_1, window_bounds = array<i64: 1, 8, 5>}, {transform_indices = @transform_2, window_bounds = array<i64: 1, 8, 8>}, {pipeline_mode = #tpu.pipeline_mode<synchronous>, transform_indices = @transform_3, window_bounds = array<i64: 16, 24>}, {pipeline_mode = #tpu.pipeline_mode<synchronous>, transform_indices = @transform_4, window_bounds = array<i64: 1, 24>}, {pipeline_mode = #tpu.pipeline_mode<synchronous>, transform_indices = @transform_5, window_bounds = array<i64: 5, 16>}, {pipeline_mode = #tpu.pipeline_mode<synchronous>, transform_indices = @transform_6, window_bounds = array<i64: 1, 16>}, {pipeline_mode = #tpu.pipeline_mode<synchronous>, transform_indices = @transform_7, window_bounds = array<i64: 16, 16>}, {pipeline_mode = #tpu.pipeline_mode<synchronous>, transform_indices = @transform_8, window_bounds = array<i64: 1, 16>}, {pipeline_mode = #tpu.pipeline_mode<synchronous>, transform_indices = @transform_9, window_bounds = array<i64: 16, 8>}, {pipeline_mode = #tpu.pipeline_mode<synchronous>, transform_indices = @transform_10, window_bounds = array<i64: 1, 8>}, {pipeline_mode = #tpu.pipeline_mode<synchronous>, transform_indices = @transform_11, window_bounds = array<i64: 4, 32, 8>}, {pipeline_mode = #tpu.pipeline_mode<synchronous>, transform_indices = @transform_12, window_bounds = array<i64: 4, 32, 8>}, {pipeline_mode = #tpu.pipeline_mode<synchronous>, transform_indices = @transform_13, window_bounds = array<i64: 4, 32, 8>}, {pipeline_mode = #tpu.pipeline_mode<synchronous>, transform_indices = @transform_14, window_bounds = array<i64: 4, 8, 32>}, {pipeline_mode = #tpu.pipeline_mode<synchronous>, transform_indices = @transform_15, window_bounds = array<i64: 1, 32>}, {pipeline_mode = #tpu.pipeline_mode<synchronous>, transform_indices = @transform_16, window_bounds = array<i64: 1, 32>}, {pipeline_mode = #tpu.pipeline_mode<synchronous>, transform_indices = @transform_17, window_bounds = array<i64: 1, 32>}, {pipeline_mode = #tpu.pipeline_mode<synchronous>, transform_indices = @transform_18, window_bounds = array<i64: 32, 64>}, {pipeline_mode = #tpu.pipeline_mode<synchronous>, transform_indices = @transform_19, window_bounds = array<i64: 1, 64>}, {pipeline_mode = #tpu.pipeline_mode<synchronous>, transform_indices = @transform_20, window_bounds = array<i64: 64, 32>}, {pipeline_mode = #tpu.pipeline_mode<synchronous>, transform_indices = @transform_21, window_bounds = array<i64: 1, 32>}, {pipeline_mode = #tpu.pipeline_mode<synchronous>, transform_indices = @transform_22, window_bounds = array<i64: 1, 32>}, {pipeline_mode = #tpu.pipeline_mode<synchronous>, transform_indices = @transform_23, window_bounds = array<i64: 1, 32>}, {pipeline_mode = #tpu.pipeline_mode<synchronous>, transform_indices = @transform_24, window_bounds = array<i64: 4, 32, 8>}, {pipeline_mode = #tpu.pipeline_mode<synchronous>, transform_indices = @transform_25, window_bounds = array<i64: 4, 32, 8>}, {pipeline_mode = #tpu.pipeline_mode<synchronous>, transform_indices = @transform_26, window_bounds = array<i64: 4, 32, 8>}, {pipeline_mode = #tpu.pipeline_mode<synchronous>, transform_indices = @transform_27, window_bounds = array<i64: 4, 8, 32>}, {pipeline_mode = #tpu.pipeline_mode<synchronous>, transform_indices = @transform_28, window_bounds = array<i64: 1, 32>}, {pipeline_mode = #tpu.pipeline_mode<synchronous>, transform_indices = @transform_29, window_bounds = array<i64: 1, 32>}, {pipeline_mode = #tpu.pipeline_mode<synchronous>, transform_indices = @transform_30, window_bounds = array<i64: 1, 32>}, {pipeline_mode = #tpu.pipeline_mode<synchronous>, transform_indices = @transform_31, window_bounds = array<i64: 32, 64>}, {pipeline_mode = #tpu.pipeline_mode<synchronous>, transform_indices = @transform_32, window_bounds = array<i64: 1, 64>}, {pipeline_mode = #tpu.pipeline_mode<synchronous>, transform_indices = @transform_33, window_bounds = array<i64: 64, 32>}, {pipeline_mode = #tpu.pipeline_mode<synchronous>, transform_indices = @transform_34, window_bounds = array<i64: 1, 32>}, {pipeline_mode = #tpu.pipeline_mode<synchronous>, transform_indices = @transform_35, window_bounds = array<i64: 1, 32>}, {pipeline_mode = #tpu.pipeline_mode<synchronous>, transform_indices = @transform_36, window_bounds = array<i64: 1, 32>}, {pipeline_mode = #tpu.pipeline_mode<synchronous>, transform_indices = @transform_37, window_bounds = array<i64: 32, 16>}, {pipeline_mode = #tpu.pipeline_mode<synchronous>, transform_indices = @transform_38, window_bounds = array<i64: 1, 16>}, {pipeline_mode = #tpu.pipeline_mode<synchronous>, transform_indices = @transform_39, window_bounds = array<i64: 16, 8>}, {pipeline_mode = #tpu.pipeline_mode<synchronous>, transform_indices = @transform_40, window_bounds = array<i64: 1, 8>}, {pipeline_mode = #tpu.pipeline_mode<synchronous>, transform_indices = @transform_41, window_bounds = array<i64: 8, 32>}, {pipeline_mode = #tpu.pipeline_mode<synchronous>, transform_indices = @transform_42, window_bounds = array<i64: 1, 32>}, {transform_indices = @transform_43, window_bounds = array<i64: 1, 8, 32>}, {transform_indices = @transform_44, window_bounds = array<i64: 1, 1, 32>}]} {
    %c0 = arith.constant 0 : index
    %c0_0 = arith.constant 0 : index
    %c0_1 = arith.constant 0 : index
    %0 = vector.load %arg1[%c0, %c0_0, %c0_1] : memref<1x8x16xf32, #tpu.memory_space<vmem>>, vector<1x8x16xf32>
    %1 = vector.shape_cast %0 : vector<1x8x16xf32> to vector<8x16xf32>
    %c0_2 = arith.constant 0 : index
    %c0_3 = arith.constant 0 : index
    %c0_4 = arith.constant 0 : index
    %2 = vector.load %arg2[%c0_2, %c0_3, %c0_4] : memref<1x8x5xf32, #tpu.memory_space<vmem>>, vector<1x8x5xf32>
    %3 = vector.shape_cast %2 : vector<1x8x5xf32> to vector<8x5xf32>
    %c0_5 = arith.constant 0 : index
    %c0_6 = arith.constant 0 : index
    %c0_7 = arith.constant 0 : index
    %4 = vector.load %arg3[%c0_5, %c0_6, %c0_7] : memref<1x8x8xf32, #tpu.memory_space<vmem>>, vector<1x8x8xf32>
    %5 = vector.shape_cast %4 : vector<1x8x8xf32> to vector<8x8xf32>
    %c0_8 = arith.constant 0 : index
    %c0_9 = arith.constant 0 : index
    %6 = vector.load %arg4[%c0_8, %c0_9] : memref<16x24xf32, #tpu.memory_space<vmem>>, vector<16x24xf32>
    %cst = arith.constant dense<0.000000e+00> : vector<8x24xf32>
    %7 = tpu.matmul %1, %6, %cst {dimension_numbers = #tpu.dot_dimension_numbers<[1], [0], [0], [1], [0, 0, 1, 1], [], []>} : vector<8x16xf32>, vector<16x24xf32>, vector<8x24xf32> -> vector<8x24xf32>
    %c0_10 = arith.constant 0 : index
    %c0_11 = arith.constant 0 : index
    %8 = vector.load %arg5[%c0_10, %c0_11] : memref<1x24xf32, #tpu.memory_space<vmem>>, vector<1x24xf32>
    %9 = vector.broadcast %8 : vector<1x24xf32> to vector<8x24xf32>
    %10 = arith.addf %7, %9 : vector<8x24xf32>
    %c0_12 = arith.constant 0 : index
    %c0_13 = arith.constant 0 : index
    %11 = vector.load %arg6[%c0_12, %c0_13] : memref<5x16xf32, #tpu.memory_space<vmem>>, vector<5x16xf32>
    %cst_14 = arith.constant dense<0.000000e+00> : vector<8x16xf32>
    %12 = tpu.matmul %3, %11, %cst_14 {dimension_numbers = #tpu.dot_dimension_numbers<[1], [0], [0], [1], [0, 0, 1, 1], [], []>} : vector<8x5xf32>, vector<5x16xf32>, vector<8x16xf32> -> vector<8x16xf32>
    %c0_15 = arith.constant 0 : index
    %c0_16 = arith.constant 0 : index
    %13 = vector.load %arg7[%c0_15, %c0_16] : memref<1x16xf32, #tpu.memory_space<vmem>>, vector<1x16xf32>
    %14 = vector.broadcast %13 : vector<1x16xf32> to vector<8x16xf32>
    %15 = arith.addf %12, %14 : vector<8x16xf32>
    %cst_17 = arith.constant 0.000000e+00 : f32
    %16 = vector.broadcast %cst_17 : f32 to vector<8x16xf32>
    %17 = arith.maximumf %15, %16 : vector<8x16xf32>
    %c0_18 = arith.constant 0 : index
    %c0_19 = arith.constant 0 : index
    %18 = vector.load %arg8[%c0_18, %c0_19] : memref<16x16xf32, #tpu.memory_space<vmem>>, vector<16x16xf32>
    %cst_20 = arith.constant dense<0.000000e+00> : vector<8x16xf32>
    %19 = tpu.matmul %17, %18, %cst_20 {dimension_numbers = #tpu.dot_dimension_numbers<[1], [0], [0], [1], [0, 0, 1, 1], [], []>} : vector<8x16xf32>, vector<16x16xf32>, vector<8x16xf32> -> vector<8x16xf32>
    %c0_21 = arith.constant 0 : index
    %c0_22 = arith.constant 0 : index
    %20 = vector.load %arg9[%c0_21, %c0_22] : memref<1x16xf32, #tpu.memory_space<vmem>>, vector<1x16xf32>
    %21 = vector.broadcast %20 : vector<1x16xf32> to vector<8x16xf32>
    %22 = arith.addf %19, %21 : vector<8x16xf32>
    %cst_23 = arith.constant 0.000000e+00 : f32
    %23 = vector.broadcast %cst_23 : f32 to vector<8x16xf32>
    %24 = arith.maximumf %22, %23 : vector<8x16xf32>
    %c0_24 = arith.constant 0 : index
    %c0_25 = arith.constant 0 : index
    %25 = vector.load %arg10[%c0_24, %c0_25] : memref<16x8xf32, #tpu.memory_space<vmem>>, vector<16x8xf32>
    %cst_26 = arith.constant dense<0.000000e+00> : vector<8x8xf32>
    %26 = tpu.matmul %24, %25, %cst_26 {dimension_numbers = #tpu.dot_dimension_numbers<[1], [0], [0], [1], [0, 0, 1, 1], [], []>} : vector<8x16xf32>, vector<16x8xf32>, vector<8x8xf32> -> vector<8x8xf32>
    %c0_27 = arith.constant 0 : index
    %c0_28 = arith.constant 0 : index
    %27 = vector.load %arg11[%c0_27, %c0_28] : memref<1x8xf32, #tpu.memory_space<vmem>>, vector<1x8xf32>
    %28 = vector.broadcast %27 : vector<1x8xf32> to vector<8x8xf32>
    %29 = arith.addf %26, %28 : vector<8x8xf32>
    %cst_29 = arith.constant 0.000000e+00 : f32
    %30 = vector.broadcast %cst_29 : f32 to vector<8x8xf32>
    %31 = arith.maximumf %29, %30 : vector<8x8xf32>
    %32 = tpu.concatenate %10, %31 in 1 : vector<8x24xf32>, vector<8x8xf32> -> vector<8x32xf32>
    %33 = vector.shape_cast %32 : vector<8x32xf32> to vector<1x8x32xf32>
    %34 = vector.shape_cast %33 : vector<1x8x32xf32> to vector<1x8x32xf32>
    %35 = vector.broadcast %34 : vector<1x8x32xf32> to vector<4x8x32xf32>
    %c0_30 = arith.constant 0 : index
    %c0_31 = arith.constant 0 : index
    %c0_32 = arith.constant 0 : index
    %36 = vector.load %arg12[%c0_30, %c0_31, %c0_32] : memref<4x32x8xf32, #tpu.memory_space<vmem>>, vector<4x32x8xf32>
    "tpu.trace_start"() <{level = 10 : i32, message = "hnd,hdk->hnk"}> : () -> ()
    %cst_33 = arith.constant dense<0.000000e+00> : vector<4x8x8xf32>
    %37 = tpu.matmul %35, %36, %cst_33 {dimension_numbers = #tpu.dot_dimension_numbers<[2], [1], [1], [2], [0, 0, 0, 1, 1, 2], [0], [0]>} : vector<4x8x32xf32>, vector<4x32x8xf32>, vector<4x8x8xf32> -> vector<4x8x8xf32>
    "tpu.trace_stop"() : () -> ()
    %c0_34 = arith.constant 0 : index
    %c0_35 = arith.constant 0 : index
    %c0_36 = arith.constant 0 : index
    %38 = vector.load %arg13[%c0_34, %c0_35, %c0_36] : memref<4x32x8xf32, #tpu.memory_space<vmem>>, vector<4x32x8xf32>
    "tpu.trace_start"() <{level = 10 : i32, message = "hnd,hdk->hnk"}> : () -> ()
    %cst_37 = arith.constant dense<0.000000e+00> : vector<4x8x8xf32>
    %39 = tpu.matmul %35, %38, %cst_37 {dimension_numbers = #tpu.dot_dimension_numbers<[2], [1], [1], [2], [0, 0, 0, 1, 1, 2], [0], [0]>} : vector<4x8x32xf32>, vector<4x32x8xf32>, vector<4x8x8xf32> -> vector<4x8x8xf32>
    "tpu.trace_stop"() : () -> ()
    %c0_38 = arith.constant 0 : index
    %c0_39 = arith.constant 0 : index
    %c0_40 = arith.constant 0 : index
    %40 = vector.load %arg14[%c0_38, %c0_39, %c0_40] : memref<4x32x8xf32, #tpu.memory_space<vmem>>, vector<4x32x8xf32>
    "tpu.trace_start"() <{level = 10 : i32, message = "hnd,hdk->hnk"}> : () -> ()
    %cst_41 = arith.constant dense<0.000000e+00> : vector<4x8x8xf32>
    %41 = tpu.matmul %35, %40, %cst_41 {dimension_numbers = #tpu.dot_dimension_numbers<[2], [1], [1], [2], [0, 0, 0, 1, 1, 2], [0], [0]>} : vector<4x8x32xf32>, vector<4x32x8xf32>, vector<4x8x8xf32> -> vector<4x8x8xf32>
    "tpu.trace_stop"() : () -> ()
    "tpu.trace_start"() <{level = 10 : i32, message = "hnk,hmk->hnm"}> : () -> ()
    %cst_42 = arith.constant dense<0.000000e+00> : vector<4x8x8xf32>
    %42 = tpu.matmul %37, %39, %cst_42 {dimension_numbers = #tpu.dot_dimension_numbers<[2], [2], [1], [1], [0, 0, 0, 1, 1, 1], [0], [0]>} : vector<4x8x8xf32>, vector<4x8x8xf32>, vector<4x8x8xf32> -> vector<4x8x8xf32>
    "tpu.trace_stop"() : () -> ()
    %cst_43 = arith.constant 0.353553385 : f32
    %43 = vector.broadcast %cst_43 : f32 to vector<4x8x8xf32>
    %44 = arith.mulf %42, %43 : vector<4x8x8xf32>
    %45 = vector.shape_cast %5 : vector<8x8xf32> to vector<1x8x8xf32>
    %cst_44 = arith.constant 0.000000e+00 : f32
    %46 = vector.broadcast %cst_44 : f32 to vector<1x8x8xf32>
    %47 = arith.cmpf ogt, %45, %46 : vector<1x8x8xf32>
    %48 = vector.shape_cast %47 : vector<1x8x8xi1> to vector<1x8x8xi1>
    %49 = vector.broadcast %48 : vector<1x8x8xi1> to vector<4x8x8xi1>
    %cst_45 = arith.constant 1.000000e-01 : f32
    %50 = vector.broadcast %cst_45 : f32 to vector<4x8x8xf32>
    %51 = arith.mulf %50, %44 : vector<4x8x8xf32>
    %52 = arith.select %49, %44, %51 : vector<4x8x8xi1>, vector<4x8x8xf32>
    %cst_46 = arith.constant 0.909090936 : f32
    %53 = vector.broadcast %cst_46 : f32 to vector<4x8x8xf32>
    %54 = arith.mulf %52, %53 : vector<4x8x8xf32>
    %cst_47 = arith.constant -5.000000e+00 : f32
    %cst_48 = arith.constant 5.000000e+00 : f32
    %55 = vector.broadcast %cst_47 : f32 to vector<4x8x8xf32>
    %56 = arith.maximumf %55, %54 : vector<4x8x8xf32>
    %57 = vector.broadcast %cst_48 : f32 to vector<4x8x8xf32>
    %58 = arith.minimumf %57, %56 : vector<4x8x8xf32>
    %59 = math.exp %58 : vector<4x8x8xf32>
    %cst_49 = arith.constant dense<0.000000e+00> : vector<4x8xf32>
    %60 = vector.multi_reduction <add>, %59, %cst_49 [2] : vector<4x8x8xf32> to vector<4x8xf32>
    %61 = vector.shape_cast %60 : vector<4x8xf32> to vector<4x8x1xf32>
    %cst_50 = arith.constant 9.99999997E-7 : f32
    %62 = vector.broadcast %cst_50 : f32 to vector<4x8x1xf32>
    %63 = arith.addf %61, %62 : vector<4x8x1xf32>
    "tpu.trace_start"() <{level = 10 : i32, message = "hnm,hmk->hnk"}> : () -> ()
    %cst_51 = arith.constant dense<0.000000e+00> : vector<4x8x8xf32>
    %64 = tpu.matmul %59, %41, %cst_51 {dimension_numbers = #tpu.dot_dimension_numbers<[2], [1], [1], [2], [0, 0, 0, 1, 1, 2], [0], [0]>} : vector<4x8x8xf32>, vector<4x8x8xf32>, vector<4x8x8xf32> -> vector<4x8x8xf32>
    "tpu.trace_stop"() : () -> ()
    %65 = tpu.reciprocal %63 {approx = true} : vector<4x8x1xf32> -> vector<4x8x1xf32>
    %66 = vector.broadcast %65 : vector<4x8x1xf32> to vector<4x8x8xf32>
    %67 = arith.mulf %64, %66 : vector<4x8x8xf32>
    %c0_52 = arith.constant 0 : index
    %c0_53 = arith.constant 0 : index
    %68 = vector.load %arg16[%c0_52, %c0_53] : memref<1x32xf32, #tpu.memory_space<vmem>>, vector<1x32xf32>
    %69 = vector.extract_strided_slice %67 {offsets = [0, 0, 0], sizes = [1, 8, 8], strides = [1, 1, 1]} : vector<4x8x8xf32> to vector<1x8x8xf32>
    %70 = vector.shape_cast %69 : vector<1x8x8xf32> to vector<8x8xf32>
    %c0_54 = arith.constant 0 : index
    %c0_55 = arith.constant 0 : index
    %c0_56 = arith.constant 0 : index
    %71 = vector.load %arg15[%c0_54, %c0_55, %c0_56] : memref<4x8x32xf32, #tpu.memory_space<vmem>>, vector<1x8x32xf32>
    %72 = vector.shape_cast %71 : vector<1x8x32xf32> to vector<8x32xf32>
    %cst_57 = arith.constant dense<0.000000e+00> : vector<8x32xf32>
    %73 = tpu.matmul %70, %72, %cst_57 {dimension_numbers = #tpu.dot_dimension_numbers<[1], [0], [0], [1], [0, 0, 1, 1], [], []>} : vector<8x8xf32>, vector<8x32xf32>, vector<8x32xf32> -> vector<8x32xf32>
    %74 = vector.broadcast %68 : vector<1x32xf32> to vector<8x32xf32>
    %75 = arith.addf %74, %73 : vector<8x32xf32>
    %76 = vector.extract_strided_slice %67 {offsets = [1, 0, 0], sizes = [1, 8, 8], strides = [1, 1, 1]} : vector<4x8x8xf32> to vector<1x8x8xf32>
    %77 = vector.shape_cast %76 : vector<1x8x8xf32> to vector<8x8xf32>
    %c1 = arith.constant 1 : index
    %c0_58 = arith.constant 0 : index
    %c0_59 = arith.constant 0 : index
    %78 = vector.load %arg15[%c1, %c0_58, %c0_59] : memref<4x8x32xf32, #tpu.memory_space<vmem>>, vector<1x8x32xf32>
    %79 = vector.shape_cast %78 : vector<1x8x32xf32> to vector<8x32xf32>
    %cst_60 = arith.constant dense<0.000000e+00> : vector<8x32xf32>
    %80 = tpu.matmul %77, %79, %cst_60 {dimension_numbers = #tpu.dot_dimension_numbers<[1], [0], [0], [1], [0, 0, 1, 1], [], []>} : vector<8x8xf32>, vector<8x32xf32>, vector<8x32xf32> -> vector<8x32xf32>
    %81 = arith.addf %75, %80 : vector<8x32xf32>
    %82 = vector.extract_strided_slice %67 {offsets = [2, 0, 0], sizes = [1, 8, 8], strides = [1, 1, 1]} : vector<4x8x8xf32> to vector<1x8x8xf32>
    %83 = vector.shape_cast %82 : vector<1x8x8xf32> to vector<8x8xf32>
    %c2 = arith.constant 2 : index
    %c0_61 = arith.constant 0 : index
    %c0_62 = arith.constant 0 : index
    %84 = vector.load %arg15[%c2, %c0_61, %c0_62] : memref<4x8x32xf32, #tpu.memory_space<vmem>>, vector<1x8x32xf32>
    %85 = vector.shape_cast %84 : vector<1x8x32xf32> to vector<8x32xf32>
    %cst_63 = arith.constant dense<0.000000e+00> : vector<8x32xf32>
    %86 = tpu.matmul %83, %85, %cst_63 {dimension_numbers = #tpu.dot_dimension_numbers<[1], [0], [0], [1], [0, 0, 1, 1], [], []>} : vector<8x8xf32>, vector<8x32xf32>, vector<8x32xf32> -> vector<8x32xf32>
    %87 = arith.addf %81, %86 : vector<8x32xf32>
    %88 = vector.extract_strided_slice %67 {offsets = [3, 0, 0], sizes = [1, 8, 8], strides = [1, 1, 1]} : vector<4x8x8xf32> to vector<1x8x8xf32>
    %89 = vector.shape_cast %88 : vector<1x8x8xf32> to vector<8x8xf32>
    %c3 = arith.constant 3 : index
    %c0_64 = arith.constant 0 : index
    %c0_65 = arith.constant 0 : index
    %90 = vector.load %arg15[%c3, %c0_64, %c0_65] : memref<4x8x32xf32, #tpu.memory_space<vmem>>, vector<1x8x32xf32>
    %91 = vector.shape_cast %90 : vector<1x8x32xf32> to vector<8x32xf32>
    %cst_66 = arith.constant dense<0.000000e+00> : vector<8x32xf32>
    %92 = tpu.matmul %89, %91, %cst_66 {dimension_numbers = #tpu.dot_dimension_numbers<[1], [0], [0], [1], [0, 0, 1, 1], [], []>} : vector<8x8xf32>, vector<8x32xf32>, vector<8x32xf32> -> vector<8x32xf32>
    %93 = arith.addf %87, %92 : vector<8x32xf32>
    %94 = arith.addf %32, %93 : vector<8x32xf32>
    %cst_67 = arith.constant dense<0.000000e+00> : vector<8xf32>
    %95 = vector.multi_reduction <add>, %94, %cst_67 [1] : vector<8x32xf32> to vector<8xf32>
    %96 = vector.shape_cast %95 : vector<8xf32> to vector<8x1xf32>
    %cst_68 = arith.constant 3.200000e+01 : f32
    %97 = vector.broadcast %cst_68 : f32 to vector<8x1xf32>
    %98 = arith.divf %96, %97 : vector<8x1xf32>
    %99 = vector.broadcast %98 : vector<8x1xf32> to vector<8x32xf32>
    %100 = arith.subf %94, %99 : vector<8x32xf32>
    %101 = arith.mulf %100, %100 : vector<8x32xf32>
    %cst_69 = arith.constant dense<0.000000e+00> : vector<8xf32>
    %102 = vector.multi_reduction <add>, %101, %cst_69 [1] : vector<8x32xf32> to vector<8xf32>
    %103 = vector.shape_cast %102 : vector<8xf32> to vector<8x1xf32>
    %cst_70 = arith.constant 3.200000e+01 : f32
    %104 = vector.broadcast %cst_70 : f32 to vector<8x1xf32>
    %105 = arith.divf %103, %104 : vector<8x1xf32>
    %106 = vector.broadcast %98 : vector<8x1xf32> to vector<8x32xf32>
    %107 = arith.subf %94, %106 : vector<8x32xf32>
    %cst_71 = arith.constant 9.99999974E-6 : f32
    %108 = vector.broadcast %cst_71 : f32 to vector<8x1xf32>
    %109 = arith.addf %105, %108 : vector<8x1xf32>
    %110 = math.rsqrt %109 : vector<8x1xf32>
    %111 = vector.broadcast %110 : vector<8x1xf32> to vector<8x32xf32>
    %112 = arith.mulf %107, %111 : vector<8x32xf32>
    %c0_72 = arith.constant 0 : index
    %c0_73 = arith.constant 0 : index
    %113 = vector.load %arg17[%c0_72, %c0_73] : memref<1x32xf32, #tpu.memory_space<vmem>>, vector<1x32xf32>
    %114 = vector.broadcast %113 : vector<1x32xf32> to vector<8x32xf32>
    %115 = arith.mulf %112, %114 : vector<8x32xf32>
    %c0_74 = arith.constant 0 : index
    %c0_75 = arith.constant 0 : index
    %116 = vector.load %arg18[%c0_74, %c0_75] : memref<1x32xf32, #tpu.memory_space<vmem>>, vector<1x32xf32>
    %117 = vector.broadcast %116 : vector<1x32xf32> to vector<8x32xf32>
    %118 = arith.addf %115, %117 : vector<8x32xf32>
    %c0_76 = arith.constant 0 : index
    %c0_77 = arith.constant 0 : index
    %119 = vector.load %arg19[%c0_76, %c0_77] : memref<32x64xf32, #tpu.memory_space<vmem>>, vector<32x64xf32>
    %cst_78 = arith.constant dense<0.000000e+00> : vector<8x64xf32>
    %120 = tpu.matmul %118, %119, %cst_78 {dimension_numbers = #tpu.dot_dimension_numbers<[1], [0], [0], [1], [0, 0, 1, 1], [], []>} : vector<8x32xf32>, vector<32x64xf32>, vector<8x64xf32> -> vector<8x64xf32>
    %c0_79 = arith.constant 0 : index
    %c0_80 = arith.constant 0 : index
    %121 = vector.load %arg20[%c0_79, %c0_80] : memref<1x64xf32, #tpu.memory_space<vmem>>, vector<1x64xf32>
    %122 = vector.broadcast %121 : vector<1x64xf32> to vector<8x64xf32>
    %123 = arith.addf %120, %122 : vector<8x64xf32>
    %cst_81 = arith.constant 0.000000e+00 : f32
    %124 = vector.broadcast %cst_81 : f32 to vector<8x64xf32>
    %125 = arith.maximumf %123, %124 : vector<8x64xf32>
    %c0_82 = arith.constant 0 : index
    %c0_83 = arith.constant 0 : index
    %126 = vector.load %arg21[%c0_82, %c0_83] : memref<64x32xf32, #tpu.memory_space<vmem>>, vector<64x32xf32>
    %cst_84 = arith.constant dense<0.000000e+00> : vector<8x32xf32>
    %127 = tpu.matmul %125, %126, %cst_84 {dimension_numbers = #tpu.dot_dimension_numbers<[1], [0], [0], [1], [0, 0, 1, 1], [], []>} : vector<8x64xf32>, vector<64x32xf32>, vector<8x32xf32> -> vector<8x32xf32>
    %c0_85 = arith.constant 0 : index
    %c0_86 = arith.constant 0 : index
    %128 = vector.load %arg22[%c0_85, %c0_86] : memref<1x32xf32, #tpu.memory_space<vmem>>, vector<1x32xf32>
    %129 = vector.broadcast %128 : vector<1x32xf32> to vector<8x32xf32>
    %130 = arith.addf %127, %129 : vector<8x32xf32>
    %131 = arith.addf %118, %130 : vector<8x32xf32>
    %cst_87 = arith.constant dense<0.000000e+00> : vector<8xf32>
    %132 = vector.multi_reduction <add>, %131, %cst_87 [1] : vector<8x32xf32> to vector<8xf32>
    %133 = vector.shape_cast %132 : vector<8xf32> to vector<8x1xf32>
    %cst_88 = arith.constant 3.200000e+01 : f32
    %134 = vector.broadcast %cst_88 : f32 to vector<8x1xf32>
    %135 = arith.divf %133, %134 : vector<8x1xf32>
    %136 = vector.broadcast %135 : vector<8x1xf32> to vector<8x32xf32>
    %137 = arith.subf %131, %136 : vector<8x32xf32>
    %138 = arith.mulf %137, %137 : vector<8x32xf32>
    %cst_89 = arith.constant dense<0.000000e+00> : vector<8xf32>
    %139 = vector.multi_reduction <add>, %138, %cst_89 [1] : vector<8x32xf32> to vector<8xf32>
    %140 = vector.shape_cast %139 : vector<8xf32> to vector<8x1xf32>
    %cst_90 = arith.constant 3.200000e+01 : f32
    %141 = vector.broadcast %cst_90 : f32 to vector<8x1xf32>
    %142 = arith.divf %140, %141 : vector<8x1xf32>
    %143 = vector.broadcast %135 : vector<8x1xf32> to vector<8x32xf32>
    %144 = arith.subf %131, %143 : vector<8x32xf32>
    %cst_91 = arith.constant 9.99999974E-6 : f32
    %145 = vector.broadcast %cst_91 : f32 to vector<8x1xf32>
    %146 = arith.addf %142, %145 : vector<8x1xf32>
    %147 = math.rsqrt %146 : vector<8x1xf32>
    %148 = vector.broadcast %147 : vector<8x1xf32> to vector<8x32xf32>
    %149 = arith.mulf %144, %148 : vector<8x32xf32>
    %c0_92 = arith.constant 0 : index
    %c0_93 = arith.constant 0 : index
    %150 = vector.load %arg23[%c0_92, %c0_93] : memref<1x32xf32, #tpu.memory_space<vmem>>, vector<1x32xf32>
    %151 = vector.broadcast %150 : vector<1x32xf32> to vector<8x32xf32>
    %152 = arith.mulf %149, %151 : vector<8x32xf32>
    %c0_94 = arith.constant 0 : index
    %c0_95 = arith.constant 0 : index
    %153 = vector.load %arg24[%c0_94, %c0_95] : memref<1x32xf32, #tpu.memory_space<vmem>>, vector<1x32xf32>
    %154 = vector.broadcast %153 : vector<1x32xf32> to vector<8x32xf32>
    %155 = arith.addf %152, %154 : vector<8x32xf32>
    %156 = vector.shape_cast %155 : vector<8x32xf32> to vector<1x8x32xf32>
    %157 = vector.shape_cast %156 : vector<1x8x32xf32> to vector<1x8x32xf32>
    %158 = vector.broadcast %157 : vector<1x8x32xf32> to vector<4x8x32xf32>
    %c0_96 = arith.constant 0 : index
    %c0_97 = arith.constant 0 : index
    %c0_98 = arith.constant 0 : index
    %159 = vector.load %arg25[%c0_96, %c0_97, %c0_98] : memref<4x32x8xf32, #tpu.memory_space<vmem>>, vector<4x32x8xf32>
    "tpu.trace_start"() <{level = 10 : i32, message = "hnd,hdk->hnk"}> : () -> ()
    %cst_99 = arith.constant dense<0.000000e+00> : vector<4x8x8xf32>
    %160 = tpu.matmul %158, %159, %cst_99 {dimension_numbers = #tpu.dot_dimension_numbers<[2], [1], [1], [2], [0, 0, 0, 1, 1, 2], [0], [0]>} : vector<4x8x32xf32>, vector<4x32x8xf32>, vector<4x8x8xf32> -> vector<4x8x8xf32>
    "tpu.trace_stop"() : () -> ()
    %c0_100 = arith.constant 0 : index
    %c0_101 = arith.constant 0 : index
    %c0_102 = arith.constant 0 : index
    %161 = vector.load %arg26[%c0_100, %c0_101, %c0_102] : memref<4x32x8xf32, #tpu.memory_space<vmem>>, vector<4x32x8xf32>
    "tpu.trace_start"() <{level = 10 : i32, message = "hnd,hdk->hnk"}> : () -> ()
    %cst_103 = arith.constant dense<0.000000e+00> : vector<4x8x8xf32>
    %162 = tpu.matmul %158, %161, %cst_103 {dimension_numbers = #tpu.dot_dimension_numbers<[2], [1], [1], [2], [0, 0, 0, 1, 1, 2], [0], [0]>} : vector<4x8x32xf32>, vector<4x32x8xf32>, vector<4x8x8xf32> -> vector<4x8x8xf32>
    "tpu.trace_stop"() : () -> ()
    %c0_104 = arith.constant 0 : index
    %c0_105 = arith.constant 0 : index
    %c0_106 = arith.constant 0 : index
    %163 = vector.load %arg27[%c0_104, %c0_105, %c0_106] : memref<4x32x8xf32, #tpu.memory_space<vmem>>, vector<4x32x8xf32>
    "tpu.trace_start"() <{level = 10 : i32, message = "hnd,hdk->hnk"}> : () -> ()
    %cst_107 = arith.constant dense<0.000000e+00> : vector<4x8x8xf32>
    %164 = tpu.matmul %158, %163, %cst_107 {dimension_numbers = #tpu.dot_dimension_numbers<[2], [1], [1], [2], [0, 0, 0, 1, 1, 2], [0], [0]>} : vector<4x8x32xf32>, vector<4x32x8xf32>, vector<4x8x8xf32> -> vector<4x8x8xf32>
    "tpu.trace_stop"() : () -> ()
    "tpu.trace_start"() <{level = 10 : i32, message = "hnk,hmk->hnm"}> : () -> ()
    %cst_108 = arith.constant dense<0.000000e+00> : vector<4x8x8xf32>
    %165 = tpu.matmul %160, %162, %cst_108 {dimension_numbers = #tpu.dot_dimension_numbers<[2], [2], [1], [1], [0, 0, 0, 1, 1, 1], [0], [0]>} : vector<4x8x8xf32>, vector<4x8x8xf32>, vector<4x8x8xf32> -> vector<4x8x8xf32>
    "tpu.trace_stop"() : () -> ()
    %cst_109 = arith.constant 0.353553385 : f32
    %166 = vector.broadcast %cst_109 : f32 to vector<4x8x8xf32>
    %167 = arith.mulf %165, %166 : vector<4x8x8xf32>
    %168 = vector.shape_cast %5 : vector<8x8xf32> to vector<1x8x8xf32>
    %cst_110 = arith.constant 0.000000e+00 : f32
    %169 = vector.broadcast %cst_110 : f32 to vector<1x8x8xf32>
    %170 = arith.cmpf ogt, %168, %169 : vector<1x8x8xf32>
    %171 = vector.shape_cast %170 : vector<1x8x8xi1> to vector<1x8x8xi1>
    %172 = vector.broadcast %171 : vector<1x8x8xi1> to vector<4x8x8xi1>
    %cst_111 = arith.constant 1.000000e-01 : f32
    %173 = vector.broadcast %cst_111 : f32 to vector<4x8x8xf32>
    %174 = arith.mulf %173, %167 : vector<4x8x8xf32>
    %175 = arith.select %172, %167, %174 : vector<4x8x8xi1>, vector<4x8x8xf32>
    %cst_112 = arith.constant 0.909090936 : f32
    %176 = vector.broadcast %cst_112 : f32 to vector<4x8x8xf32>
    %177 = arith.mulf %175, %176 : vector<4x8x8xf32>
    %cst_113 = arith.constant -5.000000e+00 : f32
    %cst_114 = arith.constant 5.000000e+00 : f32
    %178 = vector.broadcast %cst_113 : f32 to vector<4x8x8xf32>
    %179 = arith.maximumf %178, %177 : vector<4x8x8xf32>
    %180 = vector.broadcast %cst_114 : f32 to vector<4x8x8xf32>
    %181 = arith.minimumf %180, %179 : vector<4x8x8xf32>
    %182 = math.exp %181 : vector<4x8x8xf32>
    %cst_115 = arith.constant dense<0.000000e+00> : vector<4x8xf32>
    %183 = vector.multi_reduction <add>, %182, %cst_115 [2] : vector<4x8x8xf32> to vector<4x8xf32>
    %184 = vector.shape_cast %183 : vector<4x8xf32> to vector<4x8x1xf32>
    %cst_116 = arith.constant 9.99999997E-7 : f32
    %185 = vector.broadcast %cst_116 : f32 to vector<4x8x1xf32>
    %186 = arith.addf %184, %185 : vector<4x8x1xf32>
    "tpu.trace_start"() <{level = 10 : i32, message = "hnm,hmk->hnk"}> : () -> ()
    %cst_117 = arith.constant dense<0.000000e+00> : vector<4x8x8xf32>
    %187 = tpu.matmul %182, %164, %cst_117 {dimension_numbers = #tpu.dot_dimension_numbers<[2], [1], [1], [2], [0, 0, 0, 1, 1, 2], [0], [0]>} : vector<4x8x8xf32>, vector<4x8x8xf32>, vector<4x8x8xf32> -> vector<4x8x8xf32>
    "tpu.trace_stop"() : () -> ()
    %188 = tpu.reciprocal %186 {approx = true} : vector<4x8x1xf32> -> vector<4x8x1xf32>
    %189 = vector.broadcast %188 : vector<4x8x1xf32> to vector<4x8x8xf32>
    %190 = arith.mulf %187, %189 : vector<4x8x8xf32>
    %c0_118 = arith.constant 0 : index
    %c0_119 = arith.constant 0 : index
    %191 = vector.load %arg29[%c0_118, %c0_119] : memref<1x32xf32, #tpu.memory_space<vmem>>, vector<1x32xf32>
    %192 = vector.extract_strided_slice %190 {offsets = [0, 0, 0], sizes = [1, 8, 8], strides = [1, 1, 1]} : vector<4x8x8xf32> to vector<1x8x8xf32>
    %193 = vector.shape_cast %192 : vector<1x8x8xf32> to vector<8x8xf32>
    %c0_120 = arith.constant 0 : index
    %c0_121 = arith.constant 0 : index
    %c0_122 = arith.constant 0 : index
    %194 = vector.load %arg28[%c0_120, %c0_121, %c0_122] : memref<4x8x32xf32, #tpu.memory_space<vmem>>, vector<1x8x32xf32>
    %195 = vector.shape_cast %194 : vector<1x8x32xf32> to vector<8x32xf32>
    %cst_123 = arith.constant dense<0.000000e+00> : vector<8x32xf32>
    %196 = tpu.matmul %193, %195, %cst_123 {dimension_numbers = #tpu.dot_dimension_numbers<[1], [0], [0], [1], [0, 0, 1, 1], [], []>} : vector<8x8xf32>, vector<8x32xf32>, vector<8x32xf32> -> vector<8x32xf32>
    %197 = vector.broadcast %191 : vector<1x32xf32> to vector<8x32xf32>
    %198 = arith.addf %197, %196 : vector<8x32xf32>
    %199 = vector.extract_strided_slice %190 {offsets = [1, 0, 0], sizes = [1, 8, 8], strides = [1, 1, 1]} : vector<4x8x8xf32> to vector<1x8x8xf32>
    %200 = vector.shape_cast %199 : vector<1x8x8xf32> to vector<8x8xf32>
    %c1_124 = arith.constant 1 : index
    %c0_125 = arith.constant 0 : index
    %c0_126 = arith.constant 0 : index
    %201 = vector.load %arg28[%c1_124, %c0_125, %c0_126] : memref<4x8x32xf32, #tpu.memory_space<vmem>>, vector<1x8x32xf32>
    %202 = vector.shape_cast %201 : vector<1x8x32xf32> to vector<8x32xf32>
    %cst_127 = arith.constant dense<0.000000e+00> : vector<8x32xf32>
    %203 = tpu.matmul %200, %202, %cst_127 {dimension_numbers = #tpu.dot_dimension_numbers<[1], [0], [0], [1], [0, 0, 1, 1], [], []>} : vector<8x8xf32>, vector<8x32xf32>, vector<8x32xf32> -> vector<8x32xf32>
    %204 = arith.addf %198, %203 : vector<8x32xf32>
    %205 = vector.extract_strided_slice %190 {offsets = [2, 0, 0], sizes = [1, 8, 8], strides = [1, 1, 1]} : vector<4x8x8xf32> to vector<1x8x8xf32>
    %206 = vector.shape_cast %205 : vector<1x8x8xf32> to vector<8x8xf32>
    %c2_128 = arith.constant 2 : index
    %c0_129 = arith.constant 0 : index
    %c0_130 = arith.constant 0 : index
    %207 = vector.load %arg28[%c2_128, %c0_129, %c0_130] : memref<4x8x32xf32, #tpu.memory_space<vmem>>, vector<1x8x32xf32>
    %208 = vector.shape_cast %207 : vector<1x8x32xf32> to vector<8x32xf32>
    %cst_131 = arith.constant dense<0.000000e+00> : vector<8x32xf32>
    %209 = tpu.matmul %206, %208, %cst_131 {dimension_numbers = #tpu.dot_dimension_numbers<[1], [0], [0], [1], [0, 0, 1, 1], [], []>} : vector<8x8xf32>, vector<8x32xf32>, vector<8x32xf32> -> vector<8x32xf32>
    %210 = arith.addf %204, %209 : vector<8x32xf32>
    %211 = vector.extract_strided_slice %190 {offsets = [3, 0, 0], sizes = [1, 8, 8], strides = [1, 1, 1]} : vector<4x8x8xf32> to vector<1x8x8xf32>
    %212 = vector.shape_cast %211 : vector<1x8x8xf32> to vector<8x8xf32>
    %c3_132 = arith.constant 3 : index
    %c0_133 = arith.constant 0 : index
    %c0_134 = arith.constant 0 : index
    %213 = vector.load %arg28[%c3_132, %c0_133, %c0_134] : memref<4x8x32xf32, #tpu.memory_space<vmem>>, vector<1x8x32xf32>
    %214 = vector.shape_cast %213 : vector<1x8x32xf32> to vector<8x32xf32>
    %cst_135 = arith.constant dense<0.000000e+00> : vector<8x32xf32>
    %215 = tpu.matmul %212, %214, %cst_135 {dimension_numbers = #tpu.dot_dimension_numbers<[1], [0], [0], [1], [0, 0, 1, 1], [], []>} : vector<8x8xf32>, vector<8x32xf32>, vector<8x32xf32> -> vector<8x32xf32>
    %216 = arith.addf %210, %215 : vector<8x32xf32>
    %217 = arith.addf %155, %216 : vector<8x32xf32>
    %cst_136 = arith.constant dense<0.000000e+00> : vector<8xf32>
    %218 = vector.multi_reduction <add>, %217, %cst_136 [1] : vector<8x32xf32> to vector<8xf32>
    %219 = vector.shape_cast %218 : vector<8xf32> to vector<8x1xf32>
    %cst_137 = arith.constant 3.200000e+01 : f32
    %220 = vector.broadcast %cst_137 : f32 to vector<8x1xf32>
    %221 = arith.divf %219, %220 : vector<8x1xf32>
    %222 = vector.broadcast %221 : vector<8x1xf32> to vector<8x32xf32>
    %223 = arith.subf %217, %222 : vector<8x32xf32>
    %224 = arith.mulf %223, %223 : vector<8x32xf32>
    %cst_138 = arith.constant dense<0.000000e+00> : vector<8xf32>
    %225 = vector.multi_reduction <add>, %224, %cst_138 [1] : vector<8x32xf32> to vector<8xf32>
    %226 = vector.shape_cast %225 : vector<8xf32> to vector<8x1xf32>
    %cst_139 = arith.constant 3.200000e+01 : f32
    %227 = vector.broadcast %cst_139 : f32 to vector<8x1xf32>
    %228 = arith.divf %226, %227 : vector<8x1xf32>
    %229 = vector.broadcast %221 : vector<8x1xf32> to vector<8x32xf32>
    %230 = arith.subf %217, %229 : vector<8x32xf32>
    %cst_140 = arith.constant 9.99999974E-6 : f32
    %231 = vector.broadcast %cst_140 : f32 to vector<8x1xf32>
    %232 = arith.addf %228, %231 : vector<8x1xf32>
    %233 = math.rsqrt %232 : vector<8x1xf32>
    %234 = vector.broadcast %233 : vector<8x1xf32> to vector<8x32xf32>
    %235 = arith.mulf %230, %234 : vector<8x32xf32>
    %c0_141 = arith.constant 0 : index
    %c0_142 = arith.constant 0 : index
    %236 = vector.load %arg30[%c0_141, %c0_142] : memref<1x32xf32, #tpu.memory_space<vmem>>, vector<1x32xf32>
    %237 = vector.broadcast %236 : vector<1x32xf32> to vector<8x32xf32>
    %238 = arith.mulf %235, %237 : vector<8x32xf32>
    %c0_143 = arith.constant 0 : index
    %c0_144 = arith.constant 0 : index
    %239 = vector.load %arg31[%c0_143, %c0_144] : memref<1x32xf32, #tpu.memory_space<vmem>>, vector<1x32xf32>
    %240 = vector.broadcast %239 : vector<1x32xf32> to vector<8x32xf32>
    %241 = arith.addf %238, %240 : vector<8x32xf32>
    %c0_145 = arith.constant 0 : index
    %c0_146 = arith.constant 0 : index
    %242 = vector.load %arg32[%c0_145, %c0_146] : memref<32x64xf32, #tpu.memory_space<vmem>>, vector<32x64xf32>
    %cst_147 = arith.constant dense<0.000000e+00> : vector<8x64xf32>
    %243 = tpu.matmul %241, %242, %cst_147 {dimension_numbers = #tpu.dot_dimension_numbers<[1], [0], [0], [1], [0, 0, 1, 1], [], []>} : vector<8x32xf32>, vector<32x64xf32>, vector<8x64xf32> -> vector<8x64xf32>
    %c0_148 = arith.constant 0 : index
    %c0_149 = arith.constant 0 : index
    %244 = vector.load %arg33[%c0_148, %c0_149] : memref<1x64xf32, #tpu.memory_space<vmem>>, vector<1x64xf32>
    %245 = vector.broadcast %244 : vector<1x64xf32> to vector<8x64xf32>
    %246 = arith.addf %243, %245 : vector<8x64xf32>
    %cst_150 = arith.constant 0.000000e+00 : f32
    %247 = vector.broadcast %cst_150 : f32 to vector<8x64xf32>
    %248 = arith.maximumf %246, %247 : vector<8x64xf32>
    %c0_151 = arith.constant 0 : index
    %c0_152 = arith.constant 0 : index
    %249 = vector.load %arg34[%c0_151, %c0_152] : memref<64x32xf32, #tpu.memory_space<vmem>>, vector<64x32xf32>
    %cst_153 = arith.constant dense<0.000000e+00> : vector<8x32xf32>
    %250 = tpu.matmul %248, %249, %cst_153 {dimension_numbers = #tpu.dot_dimension_numbers<[1], [0], [0], [1], [0, 0, 1, 1], [], []>} : vector<8x64xf32>, vector<64x32xf32>, vector<8x32xf32> -> vector<8x32xf32>
    %c0_154 = arith.constant 0 : index
    %c0_155 = arith.constant 0 : index
    %251 = vector.load %arg35[%c0_154, %c0_155] : memref<1x32xf32, #tpu.memory_space<vmem>>, vector<1x32xf32>
    %252 = vector.broadcast %251 : vector<1x32xf32> to vector<8x32xf32>
    %253 = arith.addf %250, %252 : vector<8x32xf32>
    %254 = arith.addf %241, %253 : vector<8x32xf32>
    %cst_156 = arith.constant dense<0.000000e+00> : vector<8xf32>
    %255 = vector.multi_reduction <add>, %254, %cst_156 [1] : vector<8x32xf32> to vector<8xf32>
    %256 = vector.shape_cast %255 : vector<8xf32> to vector<8x1xf32>
    %cst_157 = arith.constant 3.200000e+01 : f32
    %257 = vector.broadcast %cst_157 : f32 to vector<8x1xf32>
    %258 = arith.divf %256, %257 : vector<8x1xf32>
    %259 = vector.broadcast %258 : vector<8x1xf32> to vector<8x32xf32>
    %260 = arith.subf %254, %259 : vector<8x32xf32>
    %261 = arith.mulf %260, %260 : vector<8x32xf32>
    %cst_158 = arith.constant dense<0.000000e+00> : vector<8xf32>
    %262 = vector.multi_reduction <add>, %261, %cst_158 [1] : vector<8x32xf32> to vector<8xf32>
    %263 = vector.shape_cast %262 : vector<8xf32> to vector<8x1xf32>
    %cst_159 = arith.constant 3.200000e+01 : f32
    %264 = vector.broadcast %cst_159 : f32 to vector<8x1xf32>
    %265 = arith.divf %263, %264 : vector<8x1xf32>
    %266 = vector.broadcast %258 : vector<8x1xf32> to vector<8x32xf32>
    %267 = arith.subf %254, %266 : vector<8x32xf32>
    %cst_160 = arith.constant 9.99999974E-6 : f32
    %268 = vector.broadcast %cst_160 : f32 to vector<8x1xf32>
    %269 = arith.addf %265, %268 : vector<8x1xf32>
    %270 = math.rsqrt %269 : vector<8x1xf32>
    %271 = vector.broadcast %270 : vector<8x1xf32> to vector<8x32xf32>
    %272 = arith.mulf %267, %271 : vector<8x32xf32>
    %c0_161 = arith.constant 0 : index
    %c0_162 = arith.constant 0 : index
    %273 = vector.load %arg36[%c0_161, %c0_162] : memref<1x32xf32, #tpu.memory_space<vmem>>, vector<1x32xf32>
    %274 = vector.broadcast %273 : vector<1x32xf32> to vector<8x32xf32>
    %275 = arith.mulf %272, %274 : vector<8x32xf32>
    %c0_163 = arith.constant 0 : index
    %c0_164 = arith.constant 0 : index
    %276 = vector.load %arg37[%c0_163, %c0_164] : memref<1x32xf32, #tpu.memory_space<vmem>>, vector<1x32xf32>
    %277 = vector.broadcast %276 : vector<1x32xf32> to vector<8x32xf32>
    %278 = arith.addf %275, %277 : vector<8x32xf32>
    %c0_165 = arith.constant 0 : index
    %c0_166 = arith.constant 0 : index
    %279 = vector.load %arg38[%c0_165, %c0_166] : memref<32x16xf32, #tpu.memory_space<vmem>>, vector<32x16xf32>
    %cst_167 = arith.constant dense<0.000000e+00> : vector<8x16xf32>
    %280 = tpu.matmul %278, %279, %cst_167 {dimension_numbers = #tpu.dot_dimension_numbers<[1], [0], [0], [1], [0, 0, 1, 1], [], []>} : vector<8x32xf32>, vector<32x16xf32>, vector<8x16xf32> -> vector<8x16xf32>
    %c0_168 = arith.constant 0 : index
    %c0_169 = arith.constant 0 : index
    %281 = vector.load %arg39[%c0_168, %c0_169] : memref<1x16xf32, #tpu.memory_space<vmem>>, vector<1x16xf32>
    %282 = vector.broadcast %281 : vector<1x16xf32> to vector<8x16xf32>
    %283 = arith.addf %280, %282 : vector<8x16xf32>
    %cst_170 = arith.constant 0.000000e+00 : f32
    %284 = vector.broadcast %cst_170 : f32 to vector<8x16xf32>
    %285 = arith.maximumf %283, %284 : vector<8x16xf32>
    %c0_171 = arith.constant 0 : index
    %c0_172 = arith.constant 0 : index
    %286 = vector.load %arg40[%c0_171, %c0_172] : memref<16x8xf32, #tpu.memory_space<vmem>>, vector<16x8xf32>
    %cst_173 = arith.constant dense<0.000000e+00> : vector<8x8xf32>
    %287 = tpu.matmul %285, %286, %cst_173 {dimension_numbers = #tpu.dot_dimension_numbers<[1], [0], [0], [1], [0, 0, 1, 1], [], []>} : vector<8x16xf32>, vector<16x8xf32>, vector<8x8xf32> -> vector<8x8xf32>
    %c0_174 = arith.constant 0 : index
    %c0_175 = arith.constant 0 : index
    %288 = vector.load %arg41[%c0_174, %c0_175] : memref<1x8xf32, #tpu.memory_space<vmem>>, vector<1x8xf32>
    %289 = vector.broadcast %288 : vector<1x8xf32> to vector<8x8xf32>
    %290 = arith.addf %287, %289 : vector<8x8xf32>
    %cst_176 = arith.constant 0.000000e+00 : f32
    %291 = vector.broadcast %cst_176 : f32 to vector<8x8xf32>
    %292 = arith.maximumf %290, %291 : vector<8x8xf32>
    %c0_177 = arith.constant 0 : index
    %c0_178 = arith.constant 0 : index
    %293 = vector.load %arg42[%c0_177, %c0_178] : memref<8x32xf32, #tpu.memory_space<vmem>>, vector<8x32xf32>
    %cst_179 = arith.constant dense<0.000000e+00> : vector<8x32xf32>
    %294 = tpu.matmul %292, %293, %cst_179 {dimension_numbers = #tpu.dot_dimension_numbers<[1], [0], [0], [1], [0, 0, 1, 1], [], []>} : vector<8x8xf32>, vector<8x32xf32>, vector<8x32xf32> -> vector<8x32xf32>
    %c0_180 = arith.constant 0 : index
    %c0_181 = arith.constant 0 : index
    %295 = vector.load %arg43[%c0_180, %c0_181] : memref<1x32xf32, #tpu.memory_space<vmem>>, vector<1x32xf32>
    %296 = vector.broadcast %295 : vector<1x32xf32> to vector<8x32xf32>
    %297 = arith.addf %294, %296 : vector<8x32xf32>
    %c0_182 = arith.constant 0 : index
    %c0_183 = arith.constant 0 : index
    %c0_184 = arith.constant 0 : index
    %298 = vector.load %arg44[%c0_182, %c0_183, %c0_184] : memref<1x8x32xf32, #tpu.memory_space<vmem>>, vector<1x8x32xf32>
    %299 = vector.shape_cast %298 : vector<1x8x32xf32> to vector<8x32xf32>
    %300 = vector.shape_cast %297 : vector<8x32xf32> to vector<1x8x32xf32>
    tpu.vector_store %arg44[%c0_182, %c0_183, %c0_184], %300 {strides = array<i32>} : memref<1x8x32xf32, #tpu.memory_space<vmem>>, vector<1x8x32xf32>,
    %cst_185 = arith.constant dense<0.000000e+00> : vector<32xf32>
    %301 = vector.multi_reduction <add>, %297, %cst_185 [0] : vector<8x32xf32> to vector<32xf32>
    %302 = vector.shape_cast %301 : vector<32xf32> to vector<1x32xf32>
    %cst_186 = arith.constant 8.000000e+00 : f32
    %303 = vector.broadcast %cst_186 : f32 to vector<1x32xf32>
    %304 = arith.divf %302, %303 : vector<1x32xf32>
    %c0_187 = arith.constant 0 : index
    %c0_188 = arith.constant 0 : index
    %c0_189 = arith.constant 0 : index
    %305 = vector.load %arg45[%c0_187, %c0_188, %c0_189] : memref<1x1x32xf32, #tpu.memory_space<vmem>>, vector<1x1x32xf32>
    %306 = vector.shape_cast %305 : vector<1x1x32xf32> to vector<1x32xf32>
    %307 = vector.shape_cast %304 : vector<1x32xf32> to vector<1x1x32xf32>
    tpu.vector_store %arg45[%c0_187, %c0_188, %c0_189], %307 {strides = array<i32>} : memref<1x1x32xf32, #tpu.memory_space<vmem>>, vector<1x1x32xf32>,
    return
  }
  func.func @transform_0(%arg0: i32) -> (i32, i32, i32) {
    %c0_i32 = arith.constant 0 : i32
    %c0_i32_0 = arith.constant 0 : i32
    %c0_i32_1 = arith.constant 0 : i32
    return %arg0, %c0_i32, %c0_i32_0 : i32, i32, i32
  }
  func.func @transform_1(%arg0: i32) -> (i32, i32, i32) {
    %c0_i32 = arith.constant 0 : i32
    %c0_i32_0 = arith.constant 0 : i32
    %c0_i32_1 = arith.constant 0 : i32
    return %arg0, %c0_i32, %c0_i32_0 : i32, i32, i32
  }
  func.func @transform_2(%arg0: i32) -> (i32, i32, i32) {
    %c0_i32 = arith.constant 0 : i32
    %c0_i32_0 = arith.constant 0 : i32
    %c0_i32_1 = arith.constant 0 : i32
    return %arg0, %c0_i32, %c0_i32_0 : i32, i32, i32
  }
  func.func @transform_3(%arg0: i32) -> (i32, i32) {
    %c0_i32 = arith.constant 0 : i32
    %c0_i32_0 = arith.constant 0 : i32
    %c0_i32_1 = arith.constant 0 : i32
    return %c0_i32, %c0_i32_0 : i32, i32
  }
  func.func @transform_4(%arg0: i32) -> (i32, i32) {
    %c0_i32 = arith.constant 0 : i32
    %c0_i32_0 = arith.constant 0 : i32
    %c0_i32_1 = arith.constant 0 : i32
    return %c0_i32, %c0_i32_0 : i32, i32
  }
  func.func @transform_5(%arg0: i32) -> (i32, i32) {
    %c0_i32 = arith.constant 0 : i32
    %c0_i32_0 = arith.constant 0 : i32
    %c0_i32_1 = arith.constant 0 : i32
    return %c0_i32, %c0_i32_0 : i32, i32
  }
  func.func @transform_6(%arg0: i32) -> (i32, i32) {
    %c0_i32 = arith.constant 0 : i32
    %c0_i32_0 = arith.constant 0 : i32
    %c0_i32_1 = arith.constant 0 : i32
    return %c0_i32, %c0_i32_0 : i32, i32
  }
  func.func @transform_7(%arg0: i32) -> (i32, i32) {
    %c0_i32 = arith.constant 0 : i32
    %c0_i32_0 = arith.constant 0 : i32
    %c0_i32_1 = arith.constant 0 : i32
    return %c0_i32, %c0_i32_0 : i32, i32
  }
  func.func @transform_8(%arg0: i32) -> (i32, i32) {
    %c0_i32 = arith.constant 0 : i32
    %c0_i32_0 = arith.constant 0 : i32
    %c0_i32_1 = arith.constant 0 : i32
    return %c0_i32, %c0_i32_0 : i32, i32
  }
  func.func @transform_9(%arg0: i32) -> (i32, i32) {
    %c0_i32 = arith.constant 0 : i32
    %c0_i32_0 = arith.constant 0 : i32
    %c0_i32_1 = arith.constant 0 : i32
    return %c0_i32, %c0_i32_0 : i32, i32
  }
  func.func @transform_10(%arg0: i32) -> (i32, i32) {
    %c0_i32 = arith.constant 0 : i32
    %c0_i32_0 = arith.constant 0 : i32
    %c0_i32_1 = arith.constant 0 : i32
    return %c0_i32, %c0_i32_0 : i32, i32
  }
  func.func @transform_11(%arg0: i32) -> (i32, i32, i32) {
    %c0_i32 = arith.constant 0 : i32
    %c0_i32_0 = arith.constant 0 : i32
    %c0_i32_1 = arith.constant 0 : i32
    %c0_i32_2 = arith.constant 0 : i32
    return %c0_i32, %c0_i32_0, %c0_i32_1 : i32, i32, i32
  }
  func.func @transform_12(%arg0: i32) -> (i32, i32, i32) {
    %c0_i32 = arith.constant 0 : i32
    %c0_i32_0 = arith.constant 0 : i32
    %c0_i32_1 = arith.constant 0 : i32
    %c0_i32_2 = arith.constant 0 : i32
    return %c0_i32, %c0_i32_0, %c0_i32_1 : i32, i32, i32
  }
  func.func @transform_13(%arg0: i32) -> (i32, i32, i32) {
    %c0_i32 = arith.constant 0 : i32
    %c0_i32_0 = arith.constant 0 : i32
    %c0_i32_1 = arith.constant 0 : i32
    %c0_i32_2 = arith.constant 0 : i32
    return %c0_i32, %c0_i32_0, %c0_i32_1 : i32, i32, i32
  }
  func.func @transform_14(%arg0: i32) -> (i32, i32, i32) {
    %c0_i32 = arith.constant 0 : i32
    %c0_i32_0 = arith.constant 0 : i32
    %c0_i32_1 = arith.constant 0 : i32
    %c0_i32_2 = arith.constant 0 : i32
    return %c0_i32, %c0_i32_0, %c0_i32_1 : i32, i32, i32
  }
  func.func @transform_15(%arg0: i32) -> (i32, i32) {
    %c0_i32 = arith.constant 0 : i32
    %c0_i32_0 = arith.constant 0 : i32
    %c0_i32_1 = arith.constant 0 : i32
    return %c0_i32, %c0_i32_0 : i32, i32
  }
  func.func @transform_16(%arg0: i32) -> (i32, i32) {
    %c0_i32 = arith.constant 0 : i32
    %c0_i32_0 = arith.constant 0 : i32
    %c0_i32_1 = arith.constant 0 : i32
    return %c0_i32, %c0_i32_0 : i32, i32
  }
  func.func @transform_17(%arg0: i32) -> (i32, i32) {
    %c0_i32 = arith.constant 0 : i32
    %c0_i32_0 = arith.constant 0 : i32
    %c0_i32_1 = arith.constant 0 : i32
    return %c0_i32, %c0_i32_0 : i32, i32
  }
  func.func @transform_18(%arg0: i32) -> (i32, i32) {
    %c0_i32 = arith.constant 0 : i32
    %c0_i32_0 = arith.constant 0 : i32
    %c0_i32_1 = arith.constant 0 : i32
    return %c0_i32, %c0_i32_0 : i32, i32
  }
  func.func @transform_19(%arg0: i32) -> (i32, i32) {
    %c0_i32 = arith.constant 0 : i32
    %c0_i32_0 = arith.constant 0 : i32
    %c0_i32_1 = arith.constant 0 : i32
    return %c0_i32, %c0_i32_0 : i32, i32
  }
  func.func @transform_20(%arg0: i32) -> (i32, i32) {
    %c0_i32 = arith.constant 0 : i32
    %c0_i32_0 = arith.constant 0 : i32
    %c0_i32_1 = arith.constant 0 : i32
    return %c0_i32, %c0_i32_0 : i32, i32
  }
  func.func @transform_21(%arg0: i32) -> (i32, i32) {
    %c0_i32 = arith.constant 0 : i32
    %c0_i32_0 = arith.constant 0 : i32
    %c0_i32_1 = arith.constant 0 : i32
    return %c0_i32, %c0_i32_0 : i32, i32
  }
  func.func @transform_22(%arg0: i32) -> (i32, i32) {
    %c0_i32 = arith.constant 0 : i32
    %c0_i32_0 = arith.constant 0 : i32
    %c0_i32_1 = arith.constant 0 : i32
    return %c0_i32, %c0_i32_0 : i32, i32
  }
  func.func @transform_23(%arg0: i32) -> (i32, i32) {
    %c0_i32 = arith.constant 0 : i32
    %c0_i32_0 = arith.constant 0 : i32
    %c0_i32_1 = arith.constant 0 : i32
    return %c0_i32, %c0_i32_0 : i32, i32
  }
  func.func @transform_24(%arg0: i32) -> (i32, i32, i32) {
    %c0_i32 = arith.constant 0 : i32
    %c0_i32_0 = arith.constant 0 : i32
    %c0_i32_1 = arith.constant 0 : i32
    %c0_i32_2 = arith.constant 0 : i32
    return %c0_i32, %c0_i32_0, %c0_i32_1 : i32, i32, i32
  }
  func.func @transform_25(%arg0: i32) -> (i32, i32, i32) {
    %c0_i32 = arith.constant 0 : i32
    %c0_i32_0 = arith.constant 0 : i32
    %c0_i32_1 = arith.constant 0 : i32
    %c0_i32_2 = arith.constant 0 : i32
    return %c0_i32, %c0_i32_0, %c0_i32_1 : i32, i32, i32
  }
  func.func @transform_26(%arg0: i32) -> (i32, i32, i32) {
    %c0_i32 = arith.constant 0 : i32
    %c0_i32_0 = arith.constant 0 : i32
    %c0_i32_1 = arith.constant 0 : i32
    %c0_i32_2 = arith.constant 0 : i32
    return %c0_i32, %c0_i32_0, %c0_i32_1 : i32, i32, i32
  }
  func.func @transform_27(%arg0: i32) -> (i32, i32, i32) {
    %c0_i32 = arith.constant 0 : i32
    %c0_i32_0 = arith.constant 0 : i32
    %c0_i32_1 = arith.constant 0 : i32
    %c0_i32_2 = arith.constant 0 : i32
    return %c0_i32, %c0_i32_0, %c0_i32_1 : i32, i32, i32
  }
  func.func @transform_28(%arg0: i32) -> (i32, i32) {
    %c0_i32 = arith.constant 0 : i32
    %c0_i32_0 = arith.constant 0 : i32
    %c0_i32_1 = arith.constant 0 : i32
    return %c0_i32, %c0_i32_0 : i32, i32
  }
  func.func @transform_29(%arg0: i32) -> (i32, i32) {
    %c0_i32 = arith.constant 0 : i32
    %c0_i32_0 = arith.constant 0 : i32
    %c0_i32_1 = arith.constant 0 : i32
    return %c0_i32, %c0_i32_0 : i32, i32
  }
  func.func @transform_30(%arg0: i32) -> (i32, i32) {
    %c0_i32 = arith.constant 0 : i32
    %c0_i32_0 = arith.constant 0 : i32
    %c0_i32_1 = arith.constant 0 : i32
    return %c0_i32, %c0_i32_0 : i32, i32
  }
  func.func @transform_31(%arg0: i32) -> (i32, i32) {
    %c0_i32 = arith.constant 0 : i32
    %c0_i32_0 = arith.constant 0 : i32
    %c0_i32_1 = arith.constant 0 : i32
    return %c0_i32, %c0_i32_0 : i32, i32
  }
  func.func @transform_32(%arg0: i32) -> (i32, i32) {
    %c0_i32 = arith.constant 0 : i32
    %c0_i32_0 = arith.constant 0 : i32
    %c0_i32_1 = arith.constant 0 : i32
    return %c0_i32, %c0_i32_0 : i32, i32
  }
  func.func @transform_33(%arg0: i32) -> (i32, i32) {
    %c0_i32 = arith.constant 0 : i32
    %c0_i32_0 = arith.constant 0 : i32
    %c0_i32_1 = arith.constant 0 : i32
    return %c0_i32, %c0_i32_0 : i32, i32
  }
  func.func @transform_34(%arg0: i32) -> (i32, i32) {
    %c0_i32 = arith.constant 0 : i32
    %c0_i32_0 = arith.constant 0 : i32
    %c0_i32_1 = arith.constant 0 : i32
    return %c0_i32, %c0_i32_0 : i32, i32
  }
  func.func @transform_35(%arg0: i32) -> (i32, i32) {
    %c0_i32 = arith.constant 0 : i32
    %c0_i32_0 = arith.constant 0 : i32
    %c0_i32_1 = arith.constant 0 : i32
    return %c0_i32, %c0_i32_0 : i32, i32
  }
  func.func @transform_36(%arg0: i32) -> (i32, i32) {
    %c0_i32 = arith.constant 0 : i32
    %c0_i32_0 = arith.constant 0 : i32
    %c0_i32_1 = arith.constant 0 : i32
    return %c0_i32, %c0_i32_0 : i32, i32
  }
  func.func @transform_37(%arg0: i32) -> (i32, i32) {
    %c0_i32 = arith.constant 0 : i32
    %c0_i32_0 = arith.constant 0 : i32
    %c0_i32_1 = arith.constant 0 : i32
    return %c0_i32, %c0_i32_0 : i32, i32
  }
  func.func @transform_38(%arg0: i32) -> (i32, i32) {
    %c0_i32 = arith.constant 0 : i32
    %c0_i32_0 = arith.constant 0 : i32
    %c0_i32_1 = arith.constant 0 : i32
    return %c0_i32, %c0_i32_0 : i32, i32
  }
  func.func @transform_39(%arg0: i32) -> (i32, i32) {
    %c0_i32 = arith.constant 0 : i32
    %c0_i32_0 = arith.constant 0 : i32
    %c0_i32_1 = arith.constant 0 : i32
    return %c0_i32, %c0_i32_0 : i32, i32
  }
  func.func @transform_40(%arg0: i32) -> (i32, i32) {
    %c0_i32 = arith.constant 0 : i32
    %c0_i32_0 = arith.constant 0 : i32
    %c0_i32_1 = arith.constant 0 : i32
    return %c0_i32, %c0_i32_0 : i32, i32
  }
  func.func @transform_41(%arg0: i32) -> (i32, i32) {
    %c0_i32 = arith.constant 0 : i32
    %c0_i32_0 = arith.constant 0 : i32
    %c0_i32_1 = arith.constant 0 : i32
    return %c0_i32, %c0_i32_0 : i32, i32
  }
  func.func @transform_42(%arg0: i32) -> (i32, i32) {
    %c0_i32 = arith.constant 0 : i32
    %c0_i32_0 = arith.constant 0 : i32
    %c0_i32_1 = arith.constant 0 : i32
    return %c0_i32, %c0_i32_0 : i32, i32
  }
  func.func @transform_43(%arg0: i32) -> (i32, i32, i32) {
    %c0_i32 = arith.constant 0 : i32
    %c0_i32_0 = arith.constant 0 : i32
    %c0_i32_1 = arith.constant 0 : i32
    return %arg0, %c0_i32, %c0_i32_0 : i32, i32, i32
  }
  func.func @transform_44(%arg0: i32) -> (i32, i32, i32) {
    %c0_i32 = arith.constant 0 : i32
    %c0_i32_0 = arith.constant 0 : i32
    %c0_i32_1 = arith.constant 0 : i32
    return %arg0, %c0_i32, %c0_i32_0 : i32, i32, i32
  }
}

</mosaic_0001>

<bundles_post_ra>
// kernel: san_leaf_batch_forward.1
= control target key start
LH: loop header
LB: loop body
LE: loop exit
PB: predicated region body
PF: predicated region fallthrough
CT: control target
= control target key end

     0   :  { %s3716_s6 = smov 1   ;;  %s3717_s10 = smov 2   ;;  %s4402_s0 = inlined_call_operand.smem [shape: u32[45], index: -1, kind: input, shape index: {}] }
   0x1   :  { %s3771_s5 = sld [smem:[%s4402_s0]]   ;;  %s3718_s14 = smov 3  }
   0x2   :  { %s3776_s9 = sld [smem:[%s4402_s0 + %s3716_s6]]   ;;  %s3719_s18 = smov 4  }
   0x3   :  { %s3781_s13 = sld [smem:[%s4402_s0 + %s3717_s10]]   ;;  %s3720_s22 = smov 5  }
   0x4   :  { %s3786_s17 = sld [smem:[%s4402_s0 + %s3718_s14]]   ;;  %s3721_s26 = smov 6  }
   0x5   :  { %s3791_s21 = sld [smem:[%s4402_s0 + %s3719_s18]]   ;;  %s3722_s30 = smov 7  }
   0x6   :  { %s3796_s25 = sld [smem:[%s4402_s0 + %s3720_s22]]   ;;  %s3723_s4 = smov 8  }
   0x7   :  { %4425 = sst [smem:[#allocation8_spill]] %s3771_s5  ;;  %s3724_s10 = smov 9  }
   0x8   :  { %4426 = sst [smem:[#allocation9_spill]] %s3776_s9  ;;  %s3725_s15 = smov 10  }
   0x9   :  { %s3801_s29 = sld [smem:[%s4402_s0 + %s3721_s26]]   ;;  %s3726_s20 = smov 11  }
   0xa   :  { %s3806_s3 = sld [smem:[%s4402_s0 + %s3722_s30]]   ;;  %s3727_s26 = smov 12  }
   0xb   :  { %s3811_s8 = sld [smem:[%s4402_s0 + %s3723_s4]]   ;;  %s3728_s1 = smov 13  }
   0xc   :  { %s3816_s14 = sld [smem:[%s4402_s0 + %s3724_s10]]   ;;  %s3729_s7 = smov 14  }
   0xd   :  { %s3821_s19 = sld [smem:[%s4402_s0 + %s3725_s15]]   ;;  %s3730_s15 = smov 15  }
   0xe   :  { %s3826_s24 = sld [smem:[%s4402_s0 + %s3726_s20]]   ;;  %s3731_s22 = smov 16  }
   0xf   :  { %s3831_s30 = sld [smem:[%s4402_s0 + %s3727_s26]]   ;;  %s3732_s28 = smov 17  }
  0x10   :  { %4427 = sst [smem:[#allocation10_spill]] %s3806_s3 }
  0x11   :  { %4428 = sst [smem:[#allocation11_spill]] %s3811_s8 }
  0x12   :  { %s3836_s6 = sld [smem:[%s4402_s0 + %s3728_s1]]  }
  0x13   :  { %s3841_s12 = sld [smem:[%s4402_s0 + %s3729_s7]]   ;;  %s3733_s7 = smov 18  }
  0x14   :  { %s3846_s20 = sld [smem:[%s4402_s0 + %s3730_s15]]   ;;  %s3734_s15 = smov 19  }
  0x15   :  { %s3851_s27 = sld [smem:[%s4402_s0 + %s3731_s22]]   ;;  %s3735_s22 = smov 20  }
  0x16   :  { %s3856_s4 = sld [smem:[%s4402_s0 + %s3732_s28]]   ;;  %s3736_s28 = smov 21  }
  0x18   :  { %4429 = sst [smem:[#allocation12_spill]] %s3836_s6 }
  0x19   :  { %4430 = sst [smem:[#allocation13_spill]] %s3841_s12 }
  0x1a   :  { %4431 = sst [smem:[#allocation14_spill]] %s3846_s20 }
  0x1b   :  { %4432 = sst [smem:[#allocation15_spill]] %s3851_s27 }
  0x1c   :  { %4433 = sst [smem:[#allocation16_spill]] %s3856_s4 }
  0x1d   :  { %s3861_s12 = sld [smem:[%s4402_s0 + %s3733_s7]]   ;;  %s3737_s7 = smov 22  }
  0x1e   :  { %s3866_s20 = sld [smem:[%s4402_s0 + %s3734_s15]]   ;;  %s3738_s15 = smov 23  }
  0x1f   :  { %s3871_s27 = sld [smem:[%s4402_s0 + %s3735_s22]]   ;;  %s3739_s22 = smov 24  }
  0x20   :  { %s3876_s4 = sld [smem:[%s4402_s0 + %s3736_s28]]   ;;  %s3740_s28 = smov 25  }
  0x23   :  { %4434 = sst [smem:[#allocation17_spill]] %s3861_s12 }
  0x24   :  { %4435 = sst [smem:[#allocation18_spill]] %s3866_s20 }
  0x25   :  { %4436 = sst [smem:[#allocation19_spill]] %s3871_s27 }
  0x26   :  { %4437 = sst [smem:[#allocation20_spill]] %s3876_s4 }
  0x27   :  { %s3881_s12 = sld [smem:[%s4402_s0 + %s3737_s7]]   ;;  %s3741_s7 = smov 26  }
  0x28   :  { %s3886_s20 = sld [smem:[%s4402_s0 + %s3738_s15]]   ;;  %s3742_s15 = smov 27  }
  0x29   :  { %s3891_s27 = sld [smem:[%s4402_s0 + %s3739_s22]]   ;;  %s3743_s22 = smov 28  }
  0x2a   :  { %s3896_s4 = sld [smem:[%s4402_s0 + %s3740_s28]]   ;;  %s3744_s28 = smov 29  }
  0x2d   :  { %4438 = sst [smem:[#allocation21_spill]] %s3881_s12 }
  0x2e   :  { %4439 = sst [smem:[#allocation22_spill]] %s3886_s20 }
  0x2f   :  { %4440 = sst [smem:[#allocation23_spill]] %s3891_s27 }
  0x30   :  { %4441 = sst [smem:[#allocation24_spill]] %s3896_s4 }
  0x31   :  { %s3901_s12 = sld [smem:[%s4402_s0 + %s3741_s7]]   ;;  %s3745_s7 = smov 30  }
  0x32   :  { %s3906_s20 = sld [smem:[%s4402_s0 + %s3742_s15]]   ;;  %s3746_s15 = smov 31  }
  0x33   :  { %s3911_s27 = sld [smem:[%s4402_s0 + %s3743_s22]]   ;;  %s3747_s22 = smov 32  }
  0x34   :  { %s3916_s4 = sld [smem:[%s4402_s0 + %s3744_s28]]   ;;  %s3748_s28 = smov 33  }
  0x37   :  { %4442 = sst [smem:[#allocation25_spill]] %s3901_s12 }
  0x38   :  { %4443 = sst [smem:[#allocation26_spill]] %s3906_s20 }
  0x39   :  { %4444 = sst [smem:[#allocation27_spill]] %s3911_s27 }
  0x3a   :  { %4445 = sst [smem:[#allocation28_spill]] %s3916_s4 }
  0x3b   :  { %s3921_s12 = sld [smem:[%s4402_s0 + %s3745_s7]]   ;;  %s3749_s7 = smov 34  }
  0x3c   :  { %s3926_s20 = sld [smem:[%s4402_s0 + %s3746_s15]]   ;;  %s3750_s15 = smov 35  }
  0x3d   :  { %s3931_s27 = sld [smem:[%s4402_s0 + %s3747_s22]]   ;;  %s3751_s22 = smov 36  }
  0x3e   :  { %s3936_s4 = sld [smem:[%s4402_s0 + %s3748_s28]]   ;;  %s3752_s28 = smov 37  }
  0x41   :  { %4446 = sst [smem:[#allocation29_spill]] %s3921_s12 }
  0x42   :  { %4447 = sst [smem:[#allocation30_spill]] %s3926_s20 }
  0x43   :  { %4448 = sst [smem:[#allocation31_spill]] %s3931_s27 }
  0x44   :  { %4449 = sst [smem:[#allocation32_spill]] %s3936_s4 }
  0x45   :  { %s3941_s12 = sld [smem:[%s4402_s0 + %s3749_s7]]   ;;  %s3753_s7 = smov 38  }
  0x46   :  { %s3946_s20 = sld [smem:[%s4402_s0 + %s3750_s15]]   ;;  %s3754_s15 = smov 39  }
  0x47   :  { %s3951_s27 = sld [smem:[%s4402_s0 + %s3751_s22]]   ;;  %s3755_s22 = smov 40  }
  0x48   :  { %s3956_s4 = sld [smem:[%s4402_s0 + %s3752_s28]]   ;;  %s3756_s28 = smov 41  }
  0x4b   :  { %4450 = sst [smem:[#allocation33_spill]] %s3941_s12 }
  0x4c   :  { %4451 = sst [smem:[#allocation34_spill]] %s3946_s20 }
  0x4d   :  { %4452 = sst [smem:[#allocation35_spill]] %s3951_s27 }
  0x4e   :  { %4453 = sst [smem:[#allocation36_spill]] %s3956_s4 }
  0x4f   :  { %s3961_s12 = sld [smem:[%s4402_s0 + %s3753_s7]]   ;;  %s3757_s7 = smov 42  }
  0x50   :  { %s3966_s20 = sld [smem:[%s4402_s0 + %s3754_s15]]   ;;  %s3758_s15 = smov 43  }
  0x51   :  { %s3971_s27 = sld [smem:[%s4402_s0 + %s3755_s22]]   ;;  %s3759_s22 = smov 44  }
  0x52   :  { %s3976_s4 = sld [smem:[%s4402_s0 + %s3756_s28]]  }
  0x55   :  { %4454 = sst [smem:[#allocation37_spill]] %s3961_s12 }
  0x56   :  { %4455 = sst [smem:[#allocation38_spill]] %s3966_s20 }
  0x57   :  { %4456 = sst [smem:[#allocation39_spill]] %s3971_s27 }
  0x58   :  { %4457 = sst [smem:[#allocation40_spill]] %s3976_s4 }
  0x59   :  { %s3981_s12 = sld [smem:[%s4402_s0 + %s3757_s7]]  }
  0x5a   :  { %s3986_s20 = sld [smem:[%s4402_s0 + %s3758_s15]]  }
  0x5b   :  { %s3991_s27 = sld [smem:[%s4402_s0 + %s3759_s22]]  }
  0x5f   :  { %4458 = sst [smem:[#allocation41_spill]] %s3981_s12 }
  0x60   :  { %95 = vsyncpa [#allocation3], 0 }
  0x61   :  { %97 = vsyncpa [#allocation3 + $0x1], 0 }
  0x62   :  { %98 = vsyncpa [#allocation5], 0 }
  0x63   :  { %100 = vsyncpa [#allocation5 + $0x1], 0  ;;  %s3993_s28 = smov 0   ;;  %s3995_s1 = smov 0  }
  0x64   :  { %s3997_s2 = smov 0   ;;  %s3999_s7 = smov 0  }
  0x65 LB: > { %s4459_s6 = sld [smem:[#allocation12_spill]]  ;;  %s4014_s0 = sadd.s32 4294967295, %s3714_s7   ;;  %s3706_s1 = sphi %s3995_s1, %s4496_s1   ;;  %s3702_s28 = sphi %s3993_s28, %s4495_s28   ;;  %s3714_s7 = sphi %s3999_s7, %s4498_s7   ;;  %s3710_s2 = sphi %s3997_s2, %s4497_s2  }
  0x66   : > { %s4460_s3 = sld [smem:[#allocation10_spill]]  ;;  %s3370_s10 = sadd.s32 4294967294, %s3714_s7  }
  0x67   : > { %s4018_s11 = sadd.s32 1, %s3714_s7   ;;  %s1031_s15 = sadd.s32 1, %s3710_s2 }
  0x68   : > { %s1028_s16 = ssub.s32 %s3714_s7, %s4018_s11  ;;  %p1041_p0 = scmp.ne.s32.totalorder %s3710_s2, %s3706_s1 }
  0x69   : > { %p1029_p1 = scmp.eq.s32.totalorder %s1028_s16, 0  ;;  %p1042_p2 = scmp.eq.s32.totalorder %s4014_s0, 1 }
  0x6a   : > { %p1047_p3 = scmp.ne.s32.totalorder %s3706_s1, %s3702_s28  ;;  %p1048_p4 = scmp.eq.s32.totalorder %s3370_s10, 1 }
  0x6b   : > { %s4029_s18 = scalar_select %p1029_p1, %s3710_s2, %s1031_s15  }
  0x6c   : > { %p4031_p5 = por %p1042_p2, %p1041_p0  ;;  %p4035_p6 = por %p1048_p4, %p1047_p3 }
  0x6d   : > { %p3373_p7 = scmp.ge.s32.totalorder %s3714_s7, 1  ;;  %p1233_p8 = scmp.lt.s32.totalorder %s3714_s7, 3 }
  0x6f   : > { %p1234_p9 = pnand %p3373_p7, %p1233_p8 }
  0x70   : > { %s4463_s9 = sld [smem:[#allocation9_spill]] (!%p1234_p9)  ;;  %p1350_p10 = scmp.lt.s32.totalorder (!%p1234_p9), %s4014_s0, 1 }
  0x71   : > { %1237 = sbr.rel (%p1234_p9) target bundleno = 3795 (0xed3), region = 192  ;;  %s4464_s5 = sld [smem:[#allocation8_spill]] (!%p1234_p9) }
  0x72   : > { %s4465_s8 = sld [smem:[#allocation11_spill]] (!%p1234_p9) }
  0x73   : > { %s4492_s4 = sld [smem:[#allocation40_spill]] (!%p1234_p9) }
  0x74   : > { %s4494_s12 = sld [smem:[#allocation41_spill]] (!%p1234_p9) }
  0x76   : > { %v1395_v0 = vld [vmem:[%s3796_s25] sm:$0x1f]  ;;  %vm1404_vm0 = vcmask 1044480   ;;  %s1351_s26 = scalar_select %p1350_p10, %s4014_s0, 1  ;;  %vm1400_vm1 = vcmask 39936   ;;  %v1430_v2 = vld [vmem:[%s4460_s3 + $0x8] sm:$0xff] }
  0x77   : > { %3379 = vmatpush.msk.msra.mxu1 %vm1404_vm0, %v1395_v0  ;;  %1452 = vmatpush.msra.mxu2 %v1430_v2  ;;  %v1429_v3 = vld [vmem:[%s4460_s3] sm:$0xff]  ;;  %vm1371_vm2 = vcmask 130048   ;;  %v1460_v8 = vld [vmem:[%s3816_s14 + $0x8] sm:$0xff]  ;;  %v1498_v17 = vld [vmem:[%s3826_s24 + $0x18] sm:$0xff]  ;;  %vm1493_vm3 = vcmask 195584   ;;  %vm1511_vm4 = vcmask 261120  }
  0x78   : > { %s4044_s10 = sshll.u32 %s1351_s26, 3  ;;  %v3555_v4 = vld [vmem:[%s3801_s29] ss:$0 sm:$0xff]  ;;  %1482 = vmatpush.msra.mxu3 %v1460_v8  ;;  %v1366_v10 = vld [vmem:[%s3786_s17 + $0x8] sm:$0xff]  ;;  %v1502_v18 = vld [vmem:[%s3826_s24 + $0x38] sm:$0xff]  ;;  %s3760_s26 = smov 24  }
  0x79   : > { %s1357_s15 = scalar_lea.vmem %s4463_s9, %s4044_s10  ;;  %1453 = vmatpush.msra.mxu2 %v1429_v3  ;;  %v1459_v9 = vld [vmem:[%s3816_s14] sm:$0xff]  ;;  %s1353_s16 = scalar_lea.vmem %s4464_s5, %s4044_s10  ;;  %1389 = vmatpush.msra.mxu0 %v1366_v10  ;;  %v1506_v19 = vld [vmem:[%s3826_s24 + $0x58] sm:$0xff]  ;;  %v1497_v21 = vld [vmem:[%s3826_s24 + $0x10] sm:$0xff]  ;;  %vm1787_vm5 = vcmask 64512   ;;  %vm2234_vm11 = vcmask 523264  }
  0x7a   : > { %v1363_v1 = vld [vmem:[%s1357_s15] sm:$0xff]  ;;  %1483 = vmatpush.msra.mxu3 %v1459_v9  ;;  %1527 = vmatpush.msrb.mxu1 %v1498_v17  ;;  %v1510_v20 = vld [vmem:[%s3826_s24 + $0x78] sm:$0xff]  ;;  %v1501_v22 = vld [vmem:[%s3826_s24 + $0x30] sm:$0xff]  ;;  %s1361_s15 = scalar_lea.vmem %s3781_s13, %s4044_s10  ;;  %s4466_s10 = sld [smem:[#allocation13_spill]] }
  0x7b   : > { %3380 = vmatmul.msk.f32.vlgmr.msra.gmra.mxu1 %vm1400_vm1, %v1363_v1  ;;  %v1365_v11 = vld [vmem:[%s3786_s17] sm:$0xff]  ;;  %1567 = vmatpush.msrb.mxu2 %v1506_v19  ;;  %v1505_v23 = vld [vmem:[%s3826_s24 + $0x50] sm:$0xff]  ;;  %v1496_v25 = vld [vmem:[%s3826_s24 + $0x8] sm:$0xff]  ;;  %s4471_s3 = sld [smem:[#allocation16_spill]] }
  0x7c   : > { %v1362_v12 = vld [vmem:[%s1353_s16] sm:$0xff]  ;;  %1390 = vmatpush.msra.mxu0 %v1365_v11  ;;  %1587 = vmatpush.msrb.mxu3 %v1510_v20  ;;  %v1509_v24 = vld [vmem:[%s3826_s24 + $0x70] sm:$0xff]  ;;  %v1500_v26 = vld [vmem:[%s3826_s24 + $0x28] sm:$0xff]  ;;  %s4467_s16 = sld [smem:[#allocation14_spill]] }
  0x7d   : > { %3378 = vmatmul.msk.f32.vlgmr.msra.gmra.mxu0 %vm1371_vm2, %v1362_v12  ;;  %v3556_v13 = vld [vmem:[%s4465_s8] ss:$0 sm:$0xff]  ;;  %1528 = vmatpush.msrb.mxu1 %v1497_v21  ;;  %v1504_v27 = vld [vmem:[%s3826_s24 + $0x48] sm:$0xff]  ;;  %v1598_v37 = vld [vmem:[%s3831_s30 + $0x18] sm:$0xff]  ;;  %s4472_s5 = sld [smem:[#allocation18_spill]] }
  0x7e   : > { %1547 = vmatpush.msrb.mxu0 %v1502_v18  ;;  %1568 = vmatpush.msrb.mxu2 %v1505_v23  ;;  %v1508_v28 = vld [vmem:[%s3826_s24 + $0x68] sm:$0xff]  ;;  %v3557_v29 = vld [vmem:[%s3821_s19] ss:$0 sm:$0xff]  ;;  %v1602_v38 = vld [vmem:[%s3831_s30 + $0x38] sm:$0xff]  ;;  %s4474_s8 = sld [smem:[#allocation23_spill]] }
  0x7f   : > { %1588 = vmatpush.msrb.mxu3 %v1509_v24  ;;  %1529 = vmatpush.msrb.mxu1 %v1496_v25  ;;  %v1495_v33 = vld [vmem:[%s3826_s24] sm:$0xff]  ;;  %v1606_v39 = vld [vmem:[%s3831_s30 + $0x58] sm:$0xff]  ;;  %v1597_v41 = vld [vmem:[%s3831_s30 + $0x10] sm:$0xff]  ;;  %s4487_s9 = sld [smem:[#allocation36_spill]] }
  0x80   : > { %1548 = vmatpush.msrb.mxu0 %v1501_v22  ;;  %1569 = vmatpush.msrb.mxu2 %v1504_v27  ;;  %v1499_v34 = vld [vmem:[%s3826_s24 + $0x20] sm:$0xff]  ;;  %v1610_v40 = vld [vmem:[%s3831_s30 + $0x78] sm:$0xff]  ;;  %v1601_v42 = vld [vmem:[%s3831_s30 + $0x30] sm:$0xff] }
  0x81   : > { %1589 = vmatpush.msrb.mxu3 %v1508_v28  ;;  %v1503_v35 = vld [vmem:[%s3826_s24 + $0x40] sm:$0xff]  ;;  %1530 = vmatpush.msrb.mxu1 %v1495_v33  ;;  %v1605_v43 = vld [vmem:[%s3831_s30 + $0x50] sm:$0xff]  ;;  %v1596_v45 = vld [vmem:[%s3831_s30 + $0x8] sm:$0xff] }
  0x82   : > { %1549 = vmatpush.msrb.mxu0 %v1500_v26  ;;  %v1507_v36 = vld [vmem:[%s3826_s24 + $0x60] sm:$0xff]  ;;  %1570 = vmatpush.msrb.mxu2 %v1503_v35  ;;  %v1609_v44 = vld [vmem:[%s3831_s30 + $0x70] sm:$0xff]  ;;  %v1600_v46 = vld [vmem:[%s3831_s30 + $0x28] sm:$0xff] }
  0x83   : > { %1590 = vmatpush.msrb.mxu3 %v1507_v36  ;;  %1623 = vmatpush.msra.mxu1 %v1598_v37  ;;  %v1604_v47 = vld [vmem:[%s3831_s30 + $0x48] sm:$0xff]  ;;  %v1595_v49 = vld [vmem:[%s3831_s30] sm:$0xff]  ;;  %v1694_v58 = vld [vmem:[%s4459_s6 + $0x18] sm:$0xff] }
  0x84   : > { %1550 = vmatpush.msrb.mxu0 %v1499_v34  ;;  %v1608_v48 = vld [vmem:[%s3831_s30 + $0x68] sm:$0xff]  ;;  %v1599_v50 = vld [vmem:[%s3831_s30 + $0x20] sm:$0xff]  ;;  %v1698_v59 = vld [vmem:[%s4459_s6 + $0x38] sm:$0xff] }
  0x85   : > { %1624 = vmatpush.msra.mxu1 %v1597_v41  ;;  %v1603_v51 = vld [vmem:[%s3831_s30 + $0x40] sm:$0xff]  ;;  %v1702_v60 = vld [vmem:[%s4459_s6 + $0x58] sm:$0xff]  ;;  %v1693_v62 = vld [vmem:[%s4459_s6 + $0x10] sm:$0xff] }
  0x86   : > { %1643 = vmatpush.msra.mxu0 %v1602_v38  ;;  %v1607_v52 = vld [vmem:[%s3831_s30 + $0x60] sm:$0xff]  ;;  %v1706_v61 = vld [vmem:[%s4459_s6 + $0x78] sm:$0xff]  ;;  %v1697_v63 = vld [vmem:[%s4459_s6 + $0x30] sm:$0xff] }
  0x87   : > { %1625 = vmatpush.msra.mxu1 %v1596_v45  ;;  %v3558_v53 = vld [vmem:[%s3791_s21] ss:$0 sm:$0xff]  ;;  %v1701_v0 = vld [vmem:[%s4459_s6 + $0x50] sm:$0xff]  ;;  %v1692_v2 = vld [vmem:[%s4459_s6 + $0x8] sm:$0xff] }
  0x88   : > { %1644 = vmatpush.msra.mxu0 %v1601_v42  ;;  %v1705_v1 = vld [vmem:[%s4459_s6 + $0x70] sm:$0xff]  ;;  %v1696_v3 = vld [vmem:[%s4459_s6 + $0x28] sm:$0xff]  ;;  %v1699_v8 = vld [vmem:[%s4459_s6 + $0x40] sm:$0xff] }
  0x89   : > { %1626 = vmatpush.msra.mxu1 %v1595_v49  ;;  %v1703_v9 = vld [vmem:[%s4459_s6 + $0x60] sm:$0xff] }
  0x8a   : > { %1645 = vmatpush.msra.mxu0 %v1600_v46  ;;  %v4147_v22 = vld [vmem:[%s1361_s15] sm:$0xff]  ;;  %s4469_s15 = sld [smem:[#allocation19_spill]] }
  0x8b   : > { %vm1896_vm6 = vcmp.gt.f32.partialorder %v4147_v22, 0.0 }
  0x8c   : > { %1646 = vmatpush.msra.mxu0 %v1599_v50 }
  0xf8   : > { %v1425_v5 = vpop.f32.mrf.mxu1 }
  0xf9   : > { %v1426_v6 = vadd.f32 %v3555_v4, %v1425_v5  ;;  %v1700_v4 = vld [vmem:[%s4459_s6 + $0x48] sm:$0xff] }
  0xfa   : > { %v1392_v54 = vpop.f32.mrf.mxu0  ;;  %v1704_v5 = vld [vmem:[%s4459_s6 + $0x68] sm:$0xff] }
  0xfb   : > { %v1428_v7 = vmax.f32 %v1426_v6, 0.0  ;;  %v1393_v55 = vadd.f32 %v3558_v53, %v1392_v54  ;;  %v1691_v6 = vld [vmem:[%s4459_s6] sm:$0xff] }
  0xfd   : > { %3381 = vmatmul.msk.f32.vlgmr.msra.gmra.mxu2 %vm1371_vm2, %v1428_v7  ;;  %v1695_v7 = vld [vmem:[%s4459_s6 + $0x20] sm:$0xff]  ;;  %s4473_s6 = sld [smem:[#allocation20_spill]] }
  0xfe   : > { %1663 = vmatpush.msra.mxu2 %v1606_v39 }
 0x100   : > { %1664 = vmatpush.msra.mxu2 %v1605_v43 }
 0x102   : > { %1665 = vmatpush.msra.mxu2 %v1604_v47 }
 0x104   : > { %1666 = vmatpush.msra.mxu2 %v1603_v51 }
 0x180   : > { %v1455_v14 = vpop.f32.mrf.mxu2 }
 0x181   : > { %v1456_v15 = vadd.f32 %v3556_v13, %v1455_v14 }
 0x183   : > { %v1458_v16 = vmax.f32 %v1456_v15, 0.0 }
 0x185   : > { %3382 = vmatmul.msk.f32.vlgmr.msra.gmra.mxu3 %vm1371_vm2, %v1458_v16 }
 0x186   : > { %1683 = vmatpush.msra.mxu3 %v1610_v40 }
 0x188   : > { %1684 = vmatpush.msra.mxu3 %v1609_v44 }
 0x18a   : > { %1685 = vmatpush.msra.mxu3 %v1608_v48 }
 0x18c   : > { %1686 = vmatpush.msra.mxu3 %v1607_v52 }
 0x208   : > { %v1485_v30 = vpop.f32.mrf.mxu3 }
 0x209   : > { %v1486_v31 = vadd.f32 %v3557_v29, %v1485_v30 }
 0x20b   : > { %v1488_v32 = vmax.f32 %v1486_v31, 0.0 }
 0x20d   : > { %1490 = vrot.lane.b32.xlu0 %v1488_v32, %s3760_s26  ;;  %s4468_s26 = sld [smem:[#allocation17_spill]] }
 0x27f   : > { %v1491_v56 = vpop.permute.xlu0 %1490 }
 0x280   : > { %v4095_v57 = vsel %vm1493_vm3, %v1393_v55, %v1491_v56 }
 0x281   : > { %3383 = vmatmul.msk.f32.vlgmr.msrb.gmra.mxu1 %vm1511_vm4, %v4095_v57  ;;  %3384 = vmatmul.msk.f32.vlgmr.msrb.gmra.mxu0 %vm1511_vm4, %v4095_v57 }
 0x282   : > { %3385 = vmatmul.msk.f32.vlgmr.msrb.gmra.mxu2 %vm1511_vm4, %v4095_v57  ;;  %3386 = vmatmul.msk.f32.vlgmr.msrb.gmra.mxu3 %vm1511_vm4, %v4095_v57 }
 0x283   : > { %1719 = vmatpush.msrb.mxu1 %v1694_v58  ;;  %1739 = vmatpush.msrb.mxu0 %v1698_v59 }
 0x284   : > { %1759 = vmatpush.msrb.mxu2 %v1702_v60  ;;  %1779 = vmatpush.msrb.mxu3 %v1706_v61  ;;  %v2044_v60 = vld [vmem:[%s4466_s10] sm:$0xff]  ;;  %v3412_v61 = vld [vmem:[%s4466_s10 + $0x8] sm:$0xff] }
 0x285   : > { %1720 = vmatpush.msrb.mxu1 %v1693_v62  ;;  %1740 = vmatpush.msrb.mxu0 %v1697_v63  ;;  %v3414_v62 = vld [vmem:[%s4466_s10 + $0x10] sm:$0xff]  ;;  %v3416_v63 = vld [vmem:[%s4466_s10 + $0x18] sm:$0xff] }
 0x286   : > { %1760 = vmatpush.msrb.mxu2 %v1701_v0  ;;  %1780 = vmatpush.msrb.mxu3 %v1705_v1 }
 0x287   : > { %1721 = vmatpush.msrb.mxu1 %v1692_v2  ;;  %1741 = vmatpush.msrb.mxu0 %v1696_v3 }
 0x288   : > { %1761 = vmatpush.msrb.mxu2 %v1700_v4  ;;  %1781 = vmatpush.msrb.mxu3 %v1704_v5 }
 0x289   : > { %3387 = vmatmul.msk.f32.vlgmr.msra.gmra.mxu1 %vm1511_vm4, %v4095_v57  ;;  %3388 = vmatmul.msk.f32.vlgmr.msra.gmra.mxu0 %vm1511_vm4, %v4095_v57 }
 0x28a   : > { %3389 = vmatmul.msk.f32.vlgmr.msra.gmra.mxu2 %vm1511_vm4, %v4095_v57  ;;  %3390 = vmatmul.msk.f32.vlgmr.msra.gmra.mxu3 %vm1511_vm4, %v4095_v57 }
 0x28b   : > { %1722 = vmatpush.msrb.mxu1 %v1691_v6  ;;  %1742 = vmatpush.msrb.mxu0 %v1695_v7 }
 0x28c   : > { %1762 = vmatpush.msrb.mxu2 %v1699_v8  ;;  %1782 = vmatpush.msrb.mxu3 %v1703_v9 }
 0x291   : > { %3391 = vmatmul.msk.f32.vlgmr.msrb.gmra.mxu1 %vm1511_vm4, %v4095_v57  ;;  %3392 = vmatmul.msk.f32.vlgmr.msrb.gmra.mxu0 %vm1511_vm4, %v4095_v57 }
 0x292   : > { %3393 = vmatmul.msk.f32.vlgmr.msrb.gmra.mxu2 %vm1511_vm4, %v4095_v57  ;;  %3394 = vmatmul.msk.f32.vlgmr.msrb.gmra.mxu3 %vm1511_vm4, %v4095_v57 }
 0x2fe   : > { %v1532_v10 = vpop.f32.mrf.mxu1  ;;  %v1552_v11 = vpop.f32.mrf.mxu0 }
 0x305   : > { %v1572_v12 = vpop.f32.mrf.mxu2  ;;  %v1592_v13 = vpop.f32.mrf.mxu3 }
 0x306   : > { %v1628_v14 = vpop.f32.mrf.mxu1  ;;  %v1648_v15 = vpop.f32.mrf.mxu0 }
 0x307   : > { %3395 = vmatpush.xpose.msk.msra.mxu1 %vm1787_vm5, %v1628_v14  ;;  %3397 = vmatpush.xpose.msk.msra.mxu0 %vm1787_vm5, %v1648_v15 }
 0x30a   : > { %3396 = vmatmul.msk.f32.vlgmr.msra.gmra.mxu1 %vm1787_vm5, %v1532_v10  ;;  %3398 = vmatmul.msk.f32.vlgmr.msra.gmra.mxu0 %vm1787_vm5, %v1552_v11 }
 0x30d   : > { %v1668_v16 = vpop.f32.mrf.mxu2  ;;  %v1688_v17 = vpop.f32.mrf.mxu3 }
 0x30e   : > { %3399 = vmatpush.xpose.msk.msra.mxu2 %vm1787_vm5, %v1668_v16  ;;  %3401 = vmatpush.xpose.msk.msra.mxu3 %vm1787_vm5, %v1688_v17  ;;  %v1724_v18 = vpop.f32.mrf.mxu1  ;;  %v1744_v19 = vpop.f32.mrf.mxu0 }
 0x30f   : > { %1961 = vmatpush.msrb.mxu1 %v1724_v18  ;;  %1984 = vmatpush.msrb.mxu0 %v1744_v19 }
 0x311   : > { %3400 = vmatmul.msk.f32.vlgmr.msra.gmra.mxu2 %vm1787_vm5, %v1572_v12  ;;  %3402 = vmatmul.msk.f32.vlgmr.msra.gmra.mxu3 %vm1787_vm5, %v1592_v13 }
 0x312   : > { %2063 = vmatpush.msra.mxu1 %v2044_v60  ;;  %2092 = vmatpush.msra.mxu0 %v3412_v61 }
 0x315   : > { %v1764_v20 = vpop.f32.mrf.mxu2  ;;  %v1784_v21 = vpop.f32.mrf.mxu3 }
 0x316   : > { %2007 = vmatpush.msrb.mxu2 %v1764_v20  ;;  %2030 = vmatpush.msrb.mxu3 %v1784_v21  ;;  %v3559_v20 = vld [vmem:[%s4467_s16] ss:$0 sm:$0xff]  ;;  %s4470_s16 = sld [smem:[#allocation15_spill]] }
 0x318   : > { %2118 = vmatpush.msra.mxu2 %v3414_v62  ;;  %2144 = vmatpush.msra.mxu3 %v3416_v63 }
 0x31c   : > { %v3560_v62 = vld [vmem:[%s4470_s16] ss:$0 sm:$0xff]  ;;  %s4478_s16 = sld [smem:[#allocation22_spill]] }
 0x387   : > { %v1811_v23 = vpop.f32.mrf.mxu1  ;;  %v1837_v24 = vpop.f32.mrf.mxu0 }
 0x388   : > { %v1892_v25 = vmul.f32 0.35355338, %v1811_v23  ;;  %v1893_v26 = vmul.f32 0.35355338, %v1837_v24 }
 0x38a   : > { %v1899_v27 = vmul.f32 0.1, %v1892_v25  ;;  %v1900_v28 = vmul.f32 0.1, %v1893_v26 }
 0x38c   : > { %v1903_v29 = vsel %vm1896_vm6, %v1892_v25, %v1899_v27  ;;  %v1904_v30 = vsel %vm1896_vm6, %v1893_v26, %v1900_v28 }
 0x38d   : > { %v1907_v31 = vmul.f32 0.90909094, %v1903_v29  ;;  %v1908_v32 = vmul.f32 0.90909094, %v1904_v30 }
 0x38f   : > { %v3403_v33 = vclamps-f32 %v1907_v31, 5.0  ;;  %v3404_v34 = vclamps-f32 %v1908_v32, 5.0  ;;  %v3761_v32 = vmov 32.0  }
 0x391   : > { %v1919_v35 = vmul.f32 1.442695, %v3403_v33  ;;  %v1921_v36 = vmul.f32 1.442695, %v3404_v34 }
 0x393   : > { %3576 = vpow2.f32 %v1919_v35 }
 0x394   : > { %3578 = vpow2.f32 %v1921_v36  ;;  %v1863_v37 = vpop.f32.mrf.mxu2  ;;  %v1889_v38 = vpop.f32.mrf.mxu3 }
 0x395   : > { %v1894_v39 = vmul.f32 0.35355338, %v1863_v37  ;;  %v1895_v40 = vmul.f32 0.35355338, %v1889_v38 }
 0x397   : > { %v1901_v41 = vmul.f32 0.1, %v1894_v39  ;;  %v1902_v42 = vmul.f32 0.1, %v1895_v40 }
 0x399   : > { %v3577_v43 = vpop.eup %3576  ;;  %v1905_v44 = vsel %vm1896_vm6, %v1894_v39, %v1901_v41  ;;  %v1906_v45 = vsel %vm1896_vm6, %v1895_v40, %v1902_v42 }
 0x39a   : > { %v3579_v46 = vpop.eup %3578  ;;  %v1909_v47 = vmul.f32 0.90909094, %v1905_v44  ;;  %v1910_v48 = vmul.f32 0.90909094, %v1906_v45  ;;  %3407 = vmatmul.msk.f32.vlgmr.msrb.gmra.mxu1 %vm1787_vm5, %v3577_v43  ;;  %v1927_v49 = vsel %vm1787_vm5, %v3577_v43, 0.0  ;;  %v2193_v43 = vld [vmem:[%s4468_s26 + $0x18] sm:$0xff] }
 0x39b   : > { %3408 = vmatmul.msk.f32.vlgmr.msrb.gmra.mxu0 %vm1787_vm5, %v3579_v46  ;;  %v1930_v50 = vsel %vm1787_vm5, %v3579_v46, 0.0  ;;  %1928 = vadd.xlane.f32.xlu1 %v1927_v49  ;;  %v2192_v44 = vld [vmem:[%s4468_s26 + $0x10] sm:$0xff]  ;;  %v2191_v45 = vld [vmem:[%s4468_s26 + $0x8] sm:$0xff]  ;;  %v2190_v46 = vld [vmem:[%s4468_s26] sm:$0xff] }
 0x39c   : > { %v3405_v51 = vclamps-f32 %v1909_v47, 5.0  ;;  %v3406_v52 = vclamps-f32 %v1910_v48, 5.0  ;;  %1931 = vadd.xlane.f32.xlu2 %v1930_v50  ;;  %2213 = vmatpush.msrb.mxu1 %v2193_v43  ;;  %v2229_v47 = vld [vmem:[%s4469_s15 + $0x38] sm:$0xff]  ;;  %v2228_v48 = vld [vmem:[%s4469_s15 + $0x30] sm:$0xff]  ;;  %v2227_v49 = vld [vmem:[%s4469_s15 + $0x28] sm:$0xff] }
 0x39d   : > { %2246 = vmatpush.msrb.mxu0 %v2229_v47  ;;  %v2304_v47 = vld [vmem:[%s4474_s8 + $0x68] sm:$0xff] }
 0x39e   : > { %v1923_v53 = vmul.f32 1.442695, %v3405_v51  ;;  %v1925_v54 = vmul.f32 1.442695, %v3406_v52  ;;  %2214 = vmatpush.msrb.mxu1 %v2192_v44  ;;  %v2226_v52 = vld [vmem:[%s4469_s15 + $0x20] sm:$0xff] }
 0x39f   : > { %2247 = vmatpush.msrb.mxu0 %v2228_v48 }
 0x3a0   : > { %3580 = vpow2.f32 %v1923_v53  ;;  %2215 = vmatpush.msrb.mxu1 %v2191_v45 }
 0x3a1   : > { %3582 = vpow2.f32 %v1925_v54  ;;  %2248 = vmatpush.msrb.mxu0 %v2227_v49  ;;  %v2225_v54 = vld [vmem:[%s4469_s15 + $0x18] sm:$0xff] }
 0x3a2   : > { %2216 = vmatpush.msrb.mxu1 %v2190_v46 }
 0x3a3   : > { %2249 = vmatpush.msrb.mxu0 %v2226_v52  ;;  %v2303_v52 = vld [vmem:[%s4474_s8 + $0x60] sm:$0xff] }
 0x3a5   : > { %2250 = vmatpush.msrb.mxu0 %v2225_v54 }
 0x3a6   : > { %v3581_v55 = vpop.eup %3580 }
 0x3a7   : > { %v3583_v56 = vpop.eup %3582  ;;  %3409 = vmatmul.msk.f32.vlgmr.msrb.gmra.mxu2 %vm1787_vm5, %v3581_v55  ;;  %v1933_v58 = vsel %vm1787_vm5, %v3581_v55, 0.0 }
 0x3a8   : > { %3410 = vmatmul.msk.f32.vlgmr.msrb.gmra.mxu3 %vm1787_vm5, %v3583_v56  ;;  %1934 = vadd.xlane.f32.xlu0 %v1933_v58  ;;  %v1936_v59 = vsel %vm1787_vm5, %v3583_v56, 0.0 }
 0x3a9   : > { %1937 = vadd.xlane.f32.xlu1 %v1936_v59 }
 0x40e   : > { %v1929_v0 = vpop.xlane.xlu1 %1928 }
 0x40f   : > { %v1932_v1 = vpop.xlane.xlu2 %1931  ;;  %v1939_v2 = vadd.f32 1e-06, %v1929_v0 }
 0x410   : > { %v1940_v3 = vadd.f32 1e-06, %v1932_v1  ;;  %v3561_v1 = vld [vmem:[%s4471_s3] ss:$0 sm:$0xff]  ;;  %s4475_s3 = sld [smem:[#allocation24_spill]] }
 0x411   : > { %3584 = vrcp.f32 %v1939_v2 }
 0x412   : > { %3586 = vrcp.f32 %v1940_v3 }
 0x416   : > { %v2392_v43 = vld [vmem:[%s4475_s3 + $0x10] sm:$0xff]  ;;  %v2391_v49 = vld [vmem:[%s4475_s3 + $0x8] sm:$0xff] }
 0x417   : > { %v3585_v4 = vpop.eup %3584  ;;  %v1963_v5 = vpop.f32.mrf.mxu1  ;;  %v2396_v45 = vld [vmem:[%s4475_s3 + $0x30] sm:$0xff] }
 0x418   : > { %v3587_v6 = vpop.eup %3586  ;;  %v2039_v7 = vmul.f32 %v3585_v4, %v1963_v5  ;;  %v1986_v8 = vpop.f32.mrf.mxu0  ;;  %v2224_v4 = vld [vmem:[%s4469_s15 + $0x10] sm:$0xff]  ;;  %v2223_v5 = vld [vmem:[%s4469_s15 + $0x8] sm:$0xff] }
 0x419   : > { %v2040_v9 = vmul.f32 %v3587_v6, %v1986_v8  ;;  %2251 = vmatpush.msrb.mxu0 %v2224_v4  ;;  %v2222_v6 = vld [vmem:[%s4469_s15] sm:$0xff] }
 0x41a   : > { %3411 = vmatmul.msk.f32.vlgmr.msra.gmra.mxu1 %vm1787_vm5, %v2039_v7  ;;  %v3562_v7 = vld [vmem:[%s4472_s5] ss:$0 sm:$0xff]  ;;  %s4476_s5 = sld [smem:[#allocation25_spill]] }
 0x41b   : > { %3413 = vmatmul.msk.f32.vlgmr.msra.gmra.mxu0 %vm1787_vm5, %v2040_v9  ;;  %v1935_v10 = vpop.xlane.xlu0 %1934 }
 0x41c   : > { %v1938_v11 = vpop.xlane.xlu1 %1937  ;;  %v1941_v12 = vadd.f32 1e-06, %v1935_v10  ;;  %2252 = vmatpush.msrb.mxu0 %v2223_v5 }
 0x41d   : > { %v1942_v13 = vadd.f32 1e-06, %v1938_v11  ;;  %v3563_v11 = vld [vmem:[%s4473_s6] ss:$0 sm:$0xff]  ;;  %s4477_s6 = sld [smem:[#allocation21_spill]] }
 0x41e   : > { %3588 = vrcp.f32 %v1941_v12  ;;  %2253 = vmatpush.msrb.mxu0 %v2222_v6  ;;  %v2405_v6 = vld [vmem:[%s4475_s3 + $0x78] sm:$0xff] }
 0x41f   : > { %3590 = vrcp.f32 %v1942_v13 }
 0x420   : > { %3592 = vrcp.f32 %v3761_v32  ;;  %v2300_v32 = vld [vmem:[%s4474_s8 + $0x48] sm:$0xff]  ;;  %v2496_v46 = vld [vmem:[%s4476_s5 + $0x50] sm:$0xff] }
 0x424   : > { %v3589_v14 = vpop.eup %3588 }
 0x425   : > { %v3591_v16 = vpop.eup %3590 }
 0x426   : > { %v3593_v33 = vpop.eup %3592 }
 0x427   : > { %v2155_v34 = vmul.f32 32.0, %v3593_v33  ;;  %vm2159_vm7 = vweird.f32 %v3593_v33 }
 0x429   : > { %v2156_v35 = vsub.f32 1.0, %v2155_v34  ;;  %v2291_v34 = vld [vmem:[%s4474_s8] sm:$0xff] }
 0x42a   : > { %v2009_v15 = vpop.f32.mrf.mxu2 }
 0x42b   : > { %v2041_v17 = vmul.f32 %v3589_v14, %v2009_v15  ;;  %v2032_v18 = vpop.f32.mrf.mxu3  ;;  %v2157_v36 = vmul.f32 %v3593_v33, %v2156_v35  ;;  %v2295_v35 = vld [vmem:[%s4474_s8 + $0x20] sm:$0xff] }
 0x42c   : > { %v2042_v19 = vmul.f32 %v3591_v16, %v2032_v18 }
 0x42d   : > { %3415 = vmatmul.msk.f32.vlgmr.msra.gmra.mxu2 %vm1787_vm5, %v2041_v17  ;;  %v2158_v37 = vadd.f32 %v3593_v33, %v2157_v36  ;;  %v2299_v36 = vld [vmem:[%s4474_s8 + $0x40] sm:$0xff] }
 0x42e   : > { %3417 = vmatmul.msk.f32.vlgmr.msra.gmra.mxu3 %vm1787_vm5, %v2042_v19 }
 0x42f   : > { %v4177_v38 = vsel %vm2159_vm7, %v3593_v33, %v2158_v37  ;;  %v2399_v33 = vld [vmem:[%s4475_s3 + $0x48] sm:$0xff]  ;;  %v2398_v37 = vld [vmem:[%s4475_s3 + $0x40] sm:$0xff] }
 0x497   : > { %v2065_v21 = vpop.f32.mrf.mxu1 }
 0x498   : > { %v2071_v23 = vadd.f32 %v3559_v20, %v2065_v21  ;;  %v2094_v24 = vpop.f32.mrf.mxu0  ;;  %v2294_v21 = vld [vmem:[%s4474_s8 + $0x18] sm:$0xff] }
 0x499   : > { %2322 = vmatpush.msrb.mxu2 %v2294_v21  ;;  %v2498_v21 = vld [vmem:[%s4476_s5 + $0x60] sm:$0xff] }
 0x49a   : > { %v2097_v25 = vadd.f32 %v2094_v24, %v2071_v23  ;;  %v2298_v23 = vld [vmem:[%s4474_s8 + $0x38] sm:$0xff] }
 0x49b   : > { %v2302_v24 = vld [vmem:[%s4474_s8 + $0x58] sm:$0xff]  ;;  %2342 = vmatpush.msrb.mxu3 %v2298_v23 }
 0x49c   : > { %2362 = vmatpush.msra.mxu1 %v2302_v24 }
 0x4b0   : > { %v2120_v26 = vpop.f32.mrf.mxu2 }
 0x4b1   : > { %v2123_v27 = vadd.f32 %v2120_v26, %v2097_v25  ;;  %v2146_v28 = vpop.f32.mrf.mxu3  ;;  %v2401_v25 = vld [vmem:[%s4475_s3 + $0x58] sm:$0xff]  ;;  %v2293_v26 = vld [vmem:[%s4474_s8 + $0x10] sm:$0xff] }
 0x4b2   : > { %2458 = vmatpush.msra.mxu0 %v2401_v25  ;;  %2323 = vmatpush.msrb.mxu2 %v2293_v26 }
 0x4b3   : > { %v2149_v29 = vadd.f32 %v2146_v28, %v2123_v27  ;;  %v2297_v27 = vld [vmem:[%s4474_s8 + $0x30] sm:$0xff] }
 0x4b4   : > { %v2301_v28 = vld [vmem:[%s4474_s8 + $0x50] sm:$0xff]  ;;  %2343 = vmatpush.msrb.mxu3 %v2297_v27 }
 0x4b5   : > { %v2150_v30 = vadd.f32 %v2149_v29, %v4095_v57  ;;  %v2400_v29 = vld [vmem:[%s4475_s3 + $0x50] sm:$0xff]  ;;  %2363 = vmatpush.msra.mxu1 %v2301_v28 }
 0x4b6   : > { %2459 = vmatpush.msra.mxu0 %v2400_v29 }
 0x4b7   : > { %v2151_v31 = vsel %vm1511_vm4, %v2150_v30, 0.0  ;;  %2364 = vmatpush.msra.mxu1 %v2300_v32 }
 0x4b8   : > { %2152 = vadd.xlane.f32.xlu2 %v2151_v31  ;;  %v2296_v31 = vld [vmem:[%s4474_s8 + $0x28] sm:$0xff]  ;;  %2460 = vmatpush.msra.mxu0 %v2399_v33 }
 0x4b9   : > { %2344 = vmatpush.msrb.mxu3 %v2296_v31  ;;  %2365 = vmatpush.msra.mxu1 %v2299_v36 }
 0x4ba   : > { %2461 = vmatpush.msra.mxu0 %v2398_v37 }
 0x4bb   : > { %2345 = vmatpush.msrb.mxu3 %v2295_v35 }
 0x52b   : > { %v2153_v57 = vpop.xlane.xlu2 %2152 }
 0x52c   : > { %v2161_v39 = vmul.f32 %v4177_v38, %v2153_v57  ;;  %v2306_v57 = vld [vmem:[%s4474_s8 + $0x78] sm:$0xff] }
 0x52e   : > { %v2162_v40 = vsub.f32 %v2150_v30, %v2161_v39  ;;  %v2292_v30 = vld [vmem:[%s4474_s8 + $0x8] sm:$0xff]  ;;  %v2393_v39 = vld [vmem:[%s4475_s3 + $0x18] sm:$0xff] }
 0x52f   : > { %2324 = vmatpush.msrb.mxu2 %v2292_v30  ;;  %2418 = vmatpush.msra.mxu3 %v2393_v39 }
 0x530   : > { %v2163_v41 = vmul.f32 %v2162_v40, %v2162_v40 }
 0x531   : > { %2325 = vmatpush.msrb.mxu2 %v2291_v34  ;;  %2419 = vmatpush.msra.mxu3 %v2392_v43 }
 0x532   : > { %v2164_v42 = vsel %vm1511_vm4, %v2163_v41, 0.0  ;;  %v2497_v41 = vld [vmem:[%s4476_s5 + $0x58] sm:$0xff] }
 0x533   : > { %2165 = vadd.xlane.f32.xlu1 %v2164_v42  ;;  %2382 = vmatpush.msra.mxu2 %v2306_v57  ;;  %v2305_v42 = vld [vmem:[%s4474_s8 + $0x70] sm:$0xff]  ;;  %s4486_s8 = sld [smem:[#allocation33_spill]] }
 0x534   : > { %2420 = vmatpush.msra.mxu3 %v2391_v49 }
 0x535   : > { %2383 = vmatpush.msra.mxu2 %v2305_v42 }
 0x537   : > { %2384 = vmatpush.msra.mxu2 %v2304_v47 }
 0x539   : > { %2385 = vmatpush.msra.mxu2 %v2303_v52 }
 0x5a6   : > { %v2166_v50 = vpop.xlane.xlu1 %2165 }
 0x5a7   : > { %v2167_v51 = vmul.f32 %v2166_v50, %v4177_v38  ;;  %v2395_v50 = vld [vmem:[%s4475_s3 + $0x28] sm:$0xff] }
 0x5a9   : > { %v2168_v53 = vadd.f32 1e-05, %v2167_v51  ;;  %v2495_v51 = vld [vmem:[%s4476_s5 + $0x48] sm:$0xff] }
 0x5ab   : > { %3594 = vrsqrt.f32 %v2168_v53  ;;  %vm2175_vm9 = vweird.f32 %v2168_v53 }
 0x5b1   : > { %v3595_v55 = vpop.eup %3594 }
 0x5b2   : > { %v2170_v56 = vmul.f32 %v3595_v55, %v2168_v53  ;;  %vm2176_vm8 = vweird.f32 %v3595_v55  ;;  %v2390_v53 = vld [vmem:[%s4475_s3] sm:$0xff] }
 0x5b3   : > { %vm2177_vm10 = vmor %vm2175_vm9, %vm2176_vm8  ;;  %2421 = vmatpush.msra.mxu3 %v2390_v53 }
 0x5b4   : > { %v2171_v58 = vmul.f32 %v3595_v55, %v2170_v56  ;;  %v2494_v56 = vld [vmem:[%s4476_s5 + $0x40] sm:$0xff] }
 0x5b6   : > { %v2172_v59 = vmul.f32 0.5, %v2171_v58 }
 0x5b8   : > { %v2173_v60 = vsub.f32 1.5, %v2172_v59 }
 0x5ba   : > { %v2174_v61 = vmul.f32 %v3595_v55, %v2173_v60 }
 0x5bc   : > { %v2178_v63 = vsel %vm2177_vm10, %v3595_v55, %v2174_v61  ;;  %v2394_v55 = vld [vmem:[%s4475_s3 + $0x20] sm:$0xff] }
 0x5bd   : > { %v2179_v0 = vmul.f32 %v2178_v63, %v2162_v40  ;;  %v2397_v40 = vld [vmem:[%s4475_s3 + $0x38] sm:$0xff] }
 0x5bf   : > { %v2184_v2 = vmul.f32 %v3560_v62, %v2179_v0  ;;  %v3564_v0 = vld [vmem:[%s4477_s6] ss:$0 sm:$0xff]  ;;  %s4479_s6 = sld [smem:[#allocation26_spill]] }
 0x5c1   : > { %v2189_v3 = vadd.f32 %v3561_v1, %v2184_v2  ;;  %v3565_v2 = vld [vmem:[%s4478_s16] ss:$0 sm:$0xff]  ;;  %s4480_s16 = sld [smem:[#allocation27_spill]] }
 0x5c3   : > { %3418 = vmatmul.msk.f32.vlgmr.msrb.gmra.mxu1 %vm1511_vm4, %v2189_v3 }
 0x5c4   : > { %2438 = vmatpush.msrb.mxu1 %v2397_v40 }
 0x5c6   : > { %2439 = vmatpush.msrb.mxu1 %v2396_v45 }
 0x5c8   : > { %2440 = vmatpush.msrb.mxu1 %v2395_v50 }
 0x5ca   : > { %2441 = vmatpush.msrb.mxu1 %v2394_v55 }
 0x640   : > { %v2218_v8 = vpop.f32.mrf.mxu1 }
 0x641   : > { %v2219_v9 = vadd.f32 %v3562_v7, %v2218_v8  ;;  %v2489_v7 = vld [vmem:[%s4476_s5 + $0x18] sm:$0xff] }
 0x642   : > { %v2493_v8 = vld [vmem:[%s4476_s5 + $0x38] sm:$0xff] }
 0x643   : > { %v2221_v10 = vmax.f32 %v2219_v9, 0.0  ;;  %v2404_v9 = vld [vmem:[%s4475_s3 + $0x70] sm:$0xff] }
 0x645   : > { %3419 = vmatmul.msk.f32.vlgmr.msrb.gmra.mxu0 %vm2234_vm11, %v2221_v10  ;;  %v2488_v10 = vld [vmem:[%s4476_s5 + $0x10] sm:$0xff] }
 0x646   : > { %2554 = vmatpush.msrb.mxu0 %v2497_v41 }
 0x648   : > { %2555 = vmatpush.msrb.mxu0 %v2496_v46 }
 0x64a   : > { %2556 = vmatpush.msrb.mxu0 %v2495_v51 }
 0x64c   : > { %2557 = vmatpush.msrb.mxu0 %v2494_v56 }
 0x6c2   : > { %v2255_v12 = vpop.f32.mrf.mxu0 }
 0x6c3   : > { %v2256_v13 = vadd.f32 %v3563_v11, %v2255_v12  ;;  %v2492_v11 = vld [vmem:[%s4476_s5 + $0x30] sm:$0xff]  ;;  %v2403_v12 = vld [vmem:[%s4475_s3 + $0x68] sm:$0xff] }
 0x6c5   : > { %v2258_v14 = vadd.f32 %v2256_v13, %v2189_v3  ;;  %v2487_v13 = vld [vmem:[%s4476_s5 + $0x8] sm:$0xff] }
 0x6c7   : > { %v2259_v15 = vsel %vm1511_vm4, %v2258_v14, 0.0 }
 0x6c8   : > { %2260 = vadd.xlane.f32.xlu2 %v2259_v15  ;;  %v2402_v15 = vld [vmem:[%s4475_s3 + $0x60] sm:$0xff]  ;;  %s4481_s3 = sld [smem:[#allocation30_spill]] }
 0x73b   : > { %v2261_v16 = vpop.xlane.xlu2 %2260 }
 0x73c   : > { %v2262_v17 = vmul.f32 %v2261_v16, %v4177_v38  ;;  %v2486_v16 = vld [vmem:[%s4476_s5] sm:$0xff] }
 0x73e   : > { %v4202_v18 = vsub.f32 %v2258_v14, %v2262_v17  ;;  %v2491_v14 = vld [vmem:[%s4476_s5 + $0x28] sm:$0xff]  ;;  %v2490_v17 = vld [vmem:[%s4476_s5 + $0x20] sm:$0xff] }
 0x740   : > { %v2264_v19 = vmul.f32 %v4202_v18, %v4202_v18 }
 0x742   : > { %v2265_v20 = vsel %vm1511_vm4, %v2264_v19, 0.0  ;;  %v2500_v19 = vld [vmem:[%s4476_s5 + $0x70] sm:$0xff] }
 0x743   : > { %2266 = vadd.xlane.f32.xlu1 %v2265_v20  ;;  %v2499_v20 = vld [vmem:[%s4476_s5 + $0x68] sm:$0xff] }
 0x7b6   : > { %v2267_v44 = vpop.xlane.xlu1 %2266 }
 0x7b7   : > { %v2268_v48 = vmul.f32 %v2267_v44, %v4177_v38 }
 0x7b9   : > { %v2269_v54 = vadd.f32 1e-05, %v2268_v48 }
 0x7bb   : > { %3596 = vrsqrt.f32 %v2269_v54  ;;  %vm2276_vm13 = vweird.f32 %v2269_v54 }
 0x7c1   : > { %v3597_v58 = vpop.eup %3596 }
 0x7c2   : > { %v2271_v59 = vmul.f32 %v3597_v58, %v2269_v54  ;;  %vm2277_vm12 = vweird.f32 %v3597_v58 }
 0x7c3   : > { %vm2278_vm14 = vmor %vm2276_vm13, %vm2277_vm12 }
 0x7c4   : > { %v2272_v60 = vmul.f32 %v3597_v58, %v2271_v59 }
 0x7c6   : > { %v2273_v61 = vmul.f32 0.5, %v2272_v60 }
 0x7c8   : > { %v2274_v62 = vsub.f32 1.5, %v2273_v61 }
 0x7ca   : > { %v2275_v63 = vmul.f32 %v3597_v58, %v2274_v62 }
 0x7cc   : > { %v2279_v1 = vsel %vm2278_vm14, %v3597_v58, %v2275_v63 }
 0x7cd   : > { %v2280_v3 = vmul.f32 %v2279_v1, %v4202_v18  ;;  %v2501_v18 = vld [vmem:[%s4476_s5 + $0x78] sm:$0xff]  ;;  %s4482_s5 = sld [smem:[#allocation32_spill]] }
 0x7cf   : > { %v2285_v4 = vmul.f32 %v3564_v0, %v2280_v3 }
 0x7d1   : > { %v4243_v5 = vadd.f32 %v3565_v2, %v2285_v4 }
 0x7d3   : > { %3420 = vmatmul.msk.f32.vlgmr.msrb.gmra.mxu2 %vm1511_vm4, %v4243_v5  ;;  %3421 = vmatmul.msk.f32.vlgmr.msrb.gmra.mxu3 %vm1511_vm4, %v4243_v5 }
 0x7d4   : > { %3422 = vmatmul.msk.f32.vlgmr.msra.gmra.mxu1 %vm1511_vm4, %v4243_v5  ;;  %3426 = vmatmul.msk.f32.vlgmr.msra.gmra.mxu0 %vm1511_vm4, %v4243_v5 }
 0x7d5   : > { %2478 = vmatpush.msrb.mxu2 %v2405_v6  ;;  %2514 = vmatpush.msrb.mxu3 %v2489_v7 }
 0x7d6   : > { %2534 = vmatpush.msra.mxu1 %v2493_v8  ;;  %v2835_v8 = vld [vmem:[%s4479_s6] sm:$0xff] }
 0x7d7   : > { %2479 = vmatpush.msrb.mxu2 %v2404_v9  ;;  %2515 = vmatpush.msrb.mxu3 %v2488_v10  ;;  %v3449_v9 = vld [vmem:[%s4479_s6 + $0x8] sm:$0xff]  ;;  %v3453_v10 = vld [vmem:[%s4479_s6 + $0x18] sm:$0xff] }
 0x7d8   : > { %2535 = vmatpush.msra.mxu1 %v2492_v11  ;;  %v3451_v11 = vld [vmem:[%s4479_s6 + $0x10] sm:$0xff]  ;;  %s4484_s6 = sld [smem:[#allocation29_spill]] }
 0x7d9   : > { %2480 = vmatpush.msrb.mxu2 %v2403_v12  ;;  %2516 = vmatpush.msrb.mxu3 %v2487_v13 }
 0x7da   : > { %2536 = vmatpush.msra.mxu1 %v2491_v14 }
 0x7db   : > { %3423 = vmatmul.msk.f32.vlgmr.msra.gmra.mxu2 %vm1511_vm4, %v4243_v5  ;;  %3424 = vmatmul.msk.f32.vlgmr.msra.gmra.mxu3 %vm1511_vm4, %v4243_v5 }
 0x7dc   : > { %3425 = vmatmul.msk.f32.vlgmr.msrb.gmra.mxu1 %vm1511_vm4, %v4243_v5  ;;  %3430 = vmatmul.msk.f32.vlgmr.msrb.gmra.mxu0 %vm1511_vm4, %v4243_v5 }
 0x7dd   : > { %2481 = vmatpush.msrb.mxu2 %v2402_v15  ;;  %2517 = vmatpush.msrb.mxu3 %v2486_v16 }
 0x7de   : > { %2537 = vmatpush.msra.mxu1 %v2490_v17 }
 0x7df   : > { %2574 = vmatpush.msra.mxu2 %v2501_v18 }
 0x7e1   : > { %2575 = vmatpush.msra.mxu2 %v2500_v19 }
 0x7e3   : > { %2576 = vmatpush.msra.mxu2 %v2499_v20  ;;  %3428 = vmatmul.msk.f32.vlgmr.msrb.gmra.mxu3 %vm1511_vm4, %v4243_v5 }
 0x7e4   : > { %3427 = vmatmul.msk.f32.vlgmr.msrb.gmra.mxu2 %vm1511_vm4, %v4243_v5  ;;  %3429 = vmatmul.msk.f32.vlgmr.msra.gmra.mxu1 %vm1511_vm4, %v4243_v5 }
 0x7e5   : > { %2577 = vmatpush.msra.mxu2 %v2498_v21 }
 0x7ec   : > { %3431 = vmatmul.msk.f32.vlgmr.msra.gmra.mxu2 %vm1511_vm4, %v4243_v5 }
 0x851   : > { %v2367_v23 = vpop.f32.mrf.mxu1  ;;  %v2463_v24 = vpop.f32.mrf.mxu0 }
 0x852   : > { %3436 = vmatpush.xpose.msk.msra.mxu0 %vm1787_vm5, %v2463_v24 }
 0x855   : > { %3437 = vmatmul.msk.f32.vlgmr.msra.gmra.mxu0 %vm1787_vm5, %v2367_v23 }
 0x856   : > { %v2327_v25 = vpop.f32.mrf.mxu2  ;;  %v2347_v26 = vpop.f32.mrf.mxu3 }
 0x859   : > { %v2443_v27 = vpop.f32.mrf.mxu1  ;;  %v2559_v28 = vpop.f32.mrf.mxu0 }
 0x85a   : > { %3434 = vmatpush.xpose.msk.msrb.mxu1 %vm1787_vm5, %v2443_v27  ;;  %2798 = vmatpush.msrb.mxu0 %v2559_v28 }
 0x85c   : > { %2909 = vmatpush.msra.mxu0 %v3451_v11  ;;  %v3006_v11 = vld [vmem:[%s4482_s5] sm:$0xff] }
 0x85d   : > { %3435 = vmatmul.msk.f32.vlgmr.msrb.gmra.mxu1 %vm1787_vm5, %v2347_v26 }
 0x85e   : > { %v2387_v29 = vpop.f32.mrf.mxu2  ;;  %v2423_v30 = vpop.f32.mrf.mxu3 }
 0x85f   : > { %3432 = vmatpush.xpose.msk.msra.mxu3 %vm1787_vm5, %v2423_v30 }
 0x861   : > { %v2539_v31 = vpop.f32.mrf.mxu1 }
 0x862   : > { %2775 = vmatpush.msra.mxu1 %v2539_v31  ;;  %3433 = vmatmul.msk.f32.vlgmr.msra.gmra.mxu3 %vm1787_vm5, %v2327_v25 }
 0x864   : > { %2883 = vmatpush.msrb.mxu1 %v3449_v9  ;;  %v3008_v9 = vld [vmem:[%s4482_s5 + $0x10] sm:$0xff] }
 0x866   : > { %v2519_v33 = vpop.f32.mrf.mxu3 }
 0x867   : > { %v2483_v32 = vpop.f32.mrf.mxu2  ;;  %2752 = vmatpush.msrb.mxu3 %v2519_v33  ;;  %v3566_v33 = vld [vmem:[%s4480_s16] ss:$0 sm:$0xff]  ;;  %s4483_s16 = sld [smem:[#allocation28_spill]] }
 0x868   : > { %3438 = vmatpush.xpose.msk.msrb.mxu2 %vm1787_vm5, %v2483_v32 }
 0x869   : > { %2854 = vmatpush.msra.mxu3 %v2835_v8 }
 0x86b   : > { %3439 = vmatmul.msk.f32.vlgmr.msrb.gmra.mxu2 %vm1787_vm5, %v2387_v29 }
 0x86f   : > { %v2579_v34 = vpop.f32.mrf.mxu2 }
 0x870   : > { %2821 = vmatpush.msra.mxu2 %v2579_v34 }
 0x872   : > { %2935 = vmatpush.msrb.mxu2 %v3453_v10  ;;  %v3007_v10 = vld [vmem:[%s4482_s5 + $0x8] sm:$0xff] }
 0x8d2   : > { %v2657_v35 = vpop.f32.mrf.mxu0 }
 0x8d3   : > { %v2688_v36 = vmul.f32 0.35355338, %v2657_v35 }
 0x8d5   : > { %v2692_v37 = vmul.f32 0.1, %v2688_v36 }
 0x8d7   : > { %v2696_v57 = vsel %vm1896_vm6, %v2688_v36, %v2692_v37 }
 0x8d8   : > { %v2700_v39 = vmul.f32 0.90909094, %v2696_v57 }
 0x8da   : > { %v3442_v40 = vclamps-f32 %v2700_v39, 5.0  ;;  %v2631_v41 = vpop.f32.mrf.mxu1 }
 0x8db   : > { %v2687_v42 = vmul.f32 0.35355338, %v2631_v41 }
 0x8dc   : > { %v2714_v43 = vmul.f32 1.442695, %v3442_v40 }
 0x8dd   : > { %v2691_v44 = vmul.f32 0.1, %v2687_v42 }
 0x8de   : > { %3598 = vpow2.f32 %v2714_v43 }
 0x8df   : > { %v2695_v45 = vsel %vm1896_vm6, %v2687_v42, %v2691_v44 }
 0x8e0   : > { %v2699_v46 = vmul.f32 0.90909094, %v2695_v45 }
 0x8e2   : > { %v3441_v47 = vclamps-f32 %v2699_v46, 5.0 }
 0x8e4   : > { %v3599_v48 = vpop.eup %3598  ;;  %v2712_v49 = vmul.f32 1.442695, %v3441_v47 }
 0x8e5   : > { %3446 = vmatmul.msk.f32.vlgmr.msrb.gmra.mxu0 %vm1787_vm5, %v3599_v48  ;;  %v2605_v50 = vpop.f32.mrf.mxu3  ;;  %v2724_v7 = vsel %vm1787_vm5, %v3599_v48, 0.0 }
 0x8e6   : > { %3600 = vpow2.f32 %v2712_v49  ;;  %v2686_v51 = vmul.f32 0.35355338, %v2605_v50  ;;  %v2977_v49 = vld [vmem:[%s4481_s3 + $0x18] sm:$0xff]  ;;  %v2976_v50 = vld [vmem:[%s4481_s3 + $0x10] sm:$0xff] }
 0x8e8   : > { %v2690_v52 = vmul.f32 0.1, %v2686_v51 }
 0x8ea   : > { %v2694_v53 = vsel %vm1896_vm6, %v2686_v51, %v2690_v52  ;;  %v2974_v51 = vld [vmem:[%s4481_s3] sm:$0xff]  ;;  %v3013_v52 = vld [vmem:[%s4482_s5 + $0x38] sm:$0xff] }
 0x8eb   : > { %v2698_v54 = vmul.f32 0.90909094, %v2694_v53  ;;  %v3012_v53 = vld [vmem:[%s4482_s5 + $0x30] sm:$0xff] }
 0x8ec   : > { %v3601_v55 = vpop.eup %3600 }
 0x8ed   : > { %v3440_v56 = vclamps-f32 %v2698_v54, 5.0  ;;  %3445 = vmatmul.msk.f32.vlgmr.msra.gmra.mxu1 %vm1787_vm5, %v3601_v55  ;;  %v2721_v22 = vsel %vm1787_vm5, %v3601_v55, 0.0  ;;  %v3011_v54 = vld [vmem:[%s4482_s5 + $0x28] sm:$0xff] }
 0x8ee   : > { %v2683_v58 = vpop.f32.mrf.mxu2  ;;  %3029 = vmatpush.msra.mxu1 %v3013_v52 }
 0x8ef   : > { %v2689_v59 = vmul.f32 0.35355338, %v2683_v58  ;;  %v2710_v60 = vmul.f32 1.442695, %v3440_v56  ;;  %v3010_v58 = vld [vmem:[%s4482_s5 + $0x20] sm:$0xff] }
 0x8f0   : > { %3030 = vmatpush.msra.mxu1 %v3012_v53 }
 0x8f1   : > { %v2693_v61 = vmul.f32 0.1, %v2689_v59  ;;  %3602 = vpow2.f32 %v2710_v60  ;;  %v3009_v60 = vld [vmem:[%s4482_s5 + $0x18] sm:$0xff]  ;;  %s4493_s5 = sld [smem:[#allocation39_spill]] }
 0x8f2   : > { %3031 = vmatpush.msra.mxu1 %v3011_v54 }
 0x8f3   : > { %v2697_v62 = vsel %vm1896_vm6, %v2689_v59, %v2693_v61 }
 0x8f4   : > { %v2701_v63 = vmul.f32 0.90909094, %v2697_v62  ;;  %3032 = vmatpush.msra.mxu1 %v3010_v58  ;;  %v3575_v58 = vld [vmem:[%s4494_s12] ss:$0 sm:$0xff] }
 0x8f6   : > { %v3443_v0 = vclamps-f32 %v2701_v63, 5.0  ;;  %3033 = vmatpush.msra.mxu1 %v3009_v60 }
 0x8f7   : > { %v3603_v1 = vpop.eup %3602 }
 0x8f8   : > { %v2716_v2 = vmul.f32 1.442695, %v3443_v0  ;;  %3444 = vmatmul.msk.f32.vlgmr.msrb.gmra.mxu3 %vm1787_vm5, %v3603_v1  ;;  %v2718_v3 = vsel %vm1787_vm5, %v3603_v1, 0.0  ;;  %3034 = vmatpush.msra.mxu1 %v3008_v9 }
 0x8f9   : > { %2719 = vadd.xlane.f32.xlu2 %v2718_v3  ;;  %2997 = vmatpush.msrb.mxu3 %v2977_v49  ;;  %v3567_v3 = vld [vmem:[%s4483_s16] ss:$0 sm:$0xff]  ;;  %s4491_s16 = sld [smem:[#allocation37_spill]] }
 0x8fa   : > { %3604 = vpow2.f32 %v2716_v2  ;;  %3035 = vmatpush.msra.mxu1 %v3007_v10 }
 0x8fb   : > { %2998 = vmatpush.msrb.mxu3 %v2976_v50 }
 0x8fc   : > { %3036 = vmatpush.msra.mxu1 %v3006_v11 }
 0x900   : > { %v3605_v4 = vpop.eup %3604 }
 0x901   : > { %3447 = vmatmul.msk.f32.vlgmr.msra.gmra.mxu2 %vm1787_vm5, %v3605_v4  ;;  %v2727_v6 = vsel %vm1787_vm5, %v3605_v4, 0.0  ;;  %2722 = vadd.xlane.f32.xlu2 %v2721_v22 }
 0x902   : > { %2728 = vadd.xlane.f32.xlu1 %v2727_v6  ;;  %v3568_v6 = vld [vmem:[%s4484_s6] ss:$0 sm:$0xff]  ;;  %s4490_s6 = sld [smem:[#allocation38_spill]] }
 0x90a   : > { %2725 = vadd.xlane.f32.xlu1 %v2724_v7 }
 0x962   : > { %v2800_v31 = vpop.f32.mrf.mxu0 }
 0x96a   : > { %v2777_v24 = vpop.f32.mrf.mxu1 }
 0x96c   : > { %v2720_v12 = vpop.xlane.xlu2 %2719 }
 0x96d   : > { %v2730_v13 = vadd.f32 1e-06, %v2720_v12 }
 0x96f   : > { %3606 = vrcp.f32 %v2730_v13 }
 0x974   : > { %v2723_v14 = vpop.xlane.xlu2 %2722 }
 0x975   : > { %v2729_v15 = vpop.xlane.xlu1 %2728  ;;  %v2731_v16 = vadd.f32 1e-06, %v2723_v14  ;;  %v3607_v18 = vpop.eup %3606 }
 0x976   : > { %v2733_v17 = vadd.f32 1e-06, %v2729_v15 }
 0x977   : > { %3608 = vrcp.f32 %v2731_v16  ;;  %v3570_v16 = vld [vmem:[%s4486_s8] ss:$0 sm:$0xff]  ;;  %s4488_s8 = sld [smem:[#allocation34_spill]] }
 0x978   : > { %3610 = vrcp.f32 %v2733_v17 }
 0x97b   : > { %v2754_v19 = vpop.f32.mrf.mxu3 }
 0x97c   : > { %v2830_v20 = vmul.f32 %v3607_v18, %v2754_v19 }
 0x97d   : > { %v2726_v21 = vpop.xlane.xlu1 %2725  ;;  %v3609_v23 = vpop.eup %3608 }
 0x97e   : > { %v2732_v25 = vadd.f32 1e-06, %v2726_v21  ;;  %v2831_v26 = vmul.f32 %v3609_v23, %v2777_v24  ;;  %3448 = vmatmul.msk.f32.vlgmr.msra.gmra.mxu3 %vm1787_vm5, %v2830_v20  ;;  %v3611_v27 = vpop.eup %3610 }
 0x980   : > { %3612 = vrcp.f32 %v2732_v25  ;;  %3450 = vmatmul.msk.f32.vlgmr.msrb.gmra.mxu1 %vm1787_vm5, %v2831_v26 }
 0x984   : > { %v2823_v28 = vpop.f32.mrf.mxu2 }
 0x985   : > { %v2833_v29 = vmul.f32 %v3611_v27, %v2823_v28  ;;  %v3077_v27 = vld [vmem:[%s4487_s9 + $0x18] sm:$0xff]  ;;  %v3076_v28 = vld [vmem:[%s4487_s9 + $0x10] sm:$0xff] }
 0x986   : > { %v3613_v30 = vpop.eup %3612  ;;  %3097 = vmatpush.msrb.mxu0 %v3077_v27 }
 0x987   : > { %v2832_v32 = vmul.f32 %v3613_v30, %v2800_v31  ;;  %3454 = vmatmul.msk.f32.vlgmr.msrb.gmra.mxu2 %vm1787_vm5, %v2833_v29  ;;  %v3075_v29 = vld [vmem:[%s4487_s9 + $0x8] sm:$0xff]  ;;  %v3074_v30 = vld [vmem:[%s4487_s9] sm:$0xff] }
 0x988   : > { %3098 = vmatpush.msrb.mxu0 %v3076_v28 }
 0x989   : > { %3452 = vmatmul.msk.f32.vlgmr.msra.gmra.mxu0 %vm1787_vm5, %v2832_v32 }
 0x98a   : > { %3099 = vmatpush.msrb.mxu0 %v3075_v29 }
 0x98c   : > { %3100 = vmatpush.msrb.mxu0 %v3074_v30 }
 0x9fd   : > { %v2885_v36 = vpop.f32.mrf.mxu1 }
 0xa01   : > { %v2856_v34 = vpop.f32.mrf.mxu3 }
 0xa02   : > { %v2862_v35 = vadd.f32 %v3566_v33, %v2856_v34 }
 0xa04   : > { %v2888_v37 = vadd.f32 %v2885_v36, %v2862_v35 }
 0xa06   : > { %v2911_v57 = vpop.f32.mrf.mxu0 }
 0xa07   : > { %v2914_v39 = vadd.f32 %v2911_v57, %v2888_v37 }
 0xa0a   : > { %v2937_v40 = vpop.f32.mrf.mxu2 }
 0xa0b   : > { %v2940_v41 = vadd.f32 %v2937_v40, %v2914_v39  ;;  %v3571_v40 = vld [vmem:[%s4488_s8] ss:$0 sm:$0xff]  ;;  %s4360_s8 = sand.u32 1, %s3706_s1  }
 0xa0c   : > { %s3183_s10 = scalar_lea.sflag [#allocation3], %s4360_s8 }
 0xa0d   : > { %v2941_v42 = vadd.f32 %v2940_v41, %v4243_v5  ;;  %v2975_v5 = vld [vmem:[%s4481_s3 + $0x8] sm:$0xff]  ;;  %s4485_s3 = sld [smem:[#allocation31_spill]] }
 0xa0e   : > { %2999 = vmatpush.msrb.mxu3 %v2975_v5  ;;  %v3136_v5 = vld [vmem:[%s4492_s4] sm:$0xff] }
 0xa0f   : > { %v2942_v43 = vsel %vm1511_vm4, %v2941_v42, 0.0 }
 0xa10   : > { %2943 = vadd.xlane.f32.xlu2 %v2942_v43  ;;  %3000 = vmatpush.msrb.mxu3 %v2974_v51  ;;  %v3574_v51 = vld [vmem:[%s4493_s5] ss:$0 sm:$0xff] }
 0xa12   : > { %3159 = vmatpush.msra.mxu3 %v3136_v5 }
 0xa13   : > { %v3569_v12 = vld [vmem:[%s4485_s3] ss:$0 sm:$0xff]  ;;  %s4489_s3 = sld [smem:[#allocation35_spill]] }
 0xa83   : > { %v2944_v44 = vpop.xlane.xlu2 %2943 }
 0xa84   : > { %v2945_v45 = vmul.f32 %v2944_v44, %v4177_v38 }
 0xa86   : > { %v2946_v46 = vsub.f32 %v2941_v42, %v2945_v45  ;;  %v3107_v45 = vld [vmem:[%s4490_s6 + $0x8] sm:$0xff] }
 0xa87   : > { %3129 = vmatpush.msra.mxu2 %v3107_v45 }
 0xa88   : > { %v2947_v47 = vmul.f32 %v2946_v46, %v2946_v46 }
 0xa8a   : > { %v2948_v48 = vsel %vm1511_vm4, %v2947_v47, 0.0  ;;  %v3573_v47 = vld [vmem:[%s4491_s16] ss:$0 sm:$0xff]  ;;  %s3374_s16 = sshll.u32 %s4360_s8, 3 }
 0xa8b   : > { %2949 = vadd.xlane.f32.xlu1 %v2948_v48  ;;  %s1343_s4 = scalar_lea.vmem [#allocation2], %s3374_s16 }
 0xa8c   : > { %s3199_s5 = sshll.u32 %s1343_s4, 4  ;;  %s3200_s5 = int_to_ptr.vmem [resolvable:$true] %s3199_s5 }
 0xafe   : > { %v2950_v55 = vpop.xlane.xlu1 %2949 }
 0xaff   : > { %v2951_v56 = vmul.f32 %v2950_v55, %v4177_v38  ;;  %v3762_v55 = vmov 8.0  }
 0xb01   : > { %v2952_v59 = vadd.f32 1e-05, %v2951_v56 }
 0xb03   : > { %3614 = vrsqrt.f32 %v2952_v59  ;;  %vm2959_vm0 = vweird.f32 %v2952_v59 }
 0xb09   : > { %v3615_v61 = vpop.eup %3614 }
 0xb0a   : > { %v2954_v62 = vmul.f32 %v3615_v61, %v2952_v59  ;;  %vm2960_vm15 = vweird.f32 %v3615_v61 }
 0xb0b   : > { %vm2961_vm1 = vmor %vm2959_vm0, %vm2960_vm15 }
 0xb0c   : > { %v2955_v63 = vmul.f32 %v3615_v61, %v2954_v62 }
 0xb0e   : > { %v2956_v0 = vmul.f32 0.5, %v2955_v63 }
 0xb10   : > { %v2957_v1 = vsub.f32 1.5, %v2956_v0 }
 0xb12   : > { %v2958_v2 = vmul.f32 %v3615_v61, %v2957_v1 }
 0xb14   : > { %v2962_v4 = vsel %vm2961_vm1, %v3615_v61, %v2958_v2 }
 0xb15   : > { %v2963_v22 = vmul.f32 %v2962_v4, %v2946_v46  ;;  %v3106_v46 = vld [vmem:[%s4490_s6] sm:$0xff] }
 0xb16   : > { %3130 = vmatpush.msra.mxu2 %v3106_v46 }
 0xb17   : > { %v2968_v7 = vmul.f32 %v3567_v3, %v2963_v22 }
 0xb19   : > { %v2973_v8 = vadd.f32 %v3568_v6, %v2968_v7 }
 0xb1b   : > { %3455 = vmatmul.msk.f32.vlgmr.msrb.gmra.mxu3 %vm1511_vm4, %v2973_v8 }
 0xb9e   : > { %v3002_v13 = vpop.f32.mrf.mxu3 }
 0xb9f   : > { %v3003_v14 = vadd.f32 %v3569_v12, %v3002_v13 }
 0xba1   : > { %v3005_v15 = vmax.f32 %v3003_v14, 0.0 }
 0xba3   : > { %3456 = vmatmul.msk.f32.vlgmr.msra.gmra.mxu1 %vm2234_vm11, %v3005_v15 }
 0xc20   : > { %v3038_v17 = vpop.f32.mrf.mxu1 }
 0xc21   : > { %v3039_v18 = vadd.f32 %v3570_v16, %v3038_v17 }
 0xc23   : > { %v3041_v19 = vadd.f32 %v3039_v18, %v2973_v8 }
 0xc25   : > { %v3042_v20 = vsel %vm1511_vm4, %v3041_v19, 0.0 }
 0xc26   : > { %3043 = vadd.xlane.f32.xlu2 %v3042_v20 }
 0xc99   : > { %v3044_v21 = vpop.xlane.xlu2 %3043 }
 0xc9a   : > { %v3045_v23 = vmul.f32 %v3044_v21, %v4177_v38 }
 0xc9c   : > { %v3046_v24 = vsub.f32 %v3041_v19, %v3045_v23 }
 0xc9e   : > { %v3047_v25 = vmul.f32 %v3046_v24, %v3046_v24 }
 0xca0   : > { %v3048_v26 = vsel %vm1511_vm4, %v3047_v25, 0.0 }
 0xca1   : > { %3049 = vadd.xlane.f32.xlu0 %v3048_v26 }
 0xd14   : > { %v3050_v31 = vpop.xlane.xlu0 %3049 }
 0xd15   : > { %v3051_v32 = vmul.f32 %v3050_v31, %v4177_v38  ;;  %v3572_v38 = vld [vmem:[%s4489_s3] ss:$0 sm:$0xff]  ;;  %s3461_s3 = sshll.u32 %s4014_s0, 3 }
 0xd16   : > { %s3197_s6 = scalar_lea.hbm %s3986_s20, %s3461_s3 }
 0xd17   : > { %v3052_v33 = vadd.f32 1e-05, %v3051_v32  ;;  %s3201_s9 = sshll.u32 %s3197_s6, 4  ;;  %s3640_s6 = scalar_lea.hbm %s3986_s20, 16  ;;  %s3202_s9 = int_to_ptr.hbm [resolvable:$true] %s3201_s9 }
 0xd18   : > { %s3634_s3 = sshra.s32 %s3202_s9, 4  ;;  %s3635_s3 = int_to_ptr.hbm [resolvable:$true] %s3634_s3 }
 0xd19   : > { %3616 = vrsqrt.f32 %v3052_v33  ;;  %vm3059_vm6 = vweird.f32 %v3052_v33  ;;  %s3636_s12 = scalar_lea.hbm %s3635_s3, 8  ;;  %p3641_p0 = scmp.lt.s32.totalorder %s3635_s3, %s3986_s20 }
 0xd1a   : > { %3618 = vrcp.f32 %v3762_v55  ;;  %p3637_p11 = scmp.ne.s32.totalorder %s3635_s3, %s3636_s12  ;;  %p3642_p1 = scmp.lt.s32.totalorder %s3640_s6, %s3636_s12 }
 0xd1c   : > { %p3638_p12 = pnand %p3637_p11, %p4031_p5  ;;  %p3643_p2 = por %p3642_p1, %p3641_p0 }
 0xd1e   : > { %p3639_p13 = pneg %p3638_p12 }
 0xd1f   : > { %v3617_v34 = vpop.eup %3616 }
 0xd20   : > { %v3054_v35 = vmul.f32 %v3617_v34, %v3052_v33  ;;  %vm3060_vm3 = vweird.f32 %v3617_v34  ;;  %v3619_v56 = vpop.eup %3618  ;;  %p3644_p3 = pnand %p3643_p2, %p3639_p13 }
 0xd21   : > { %vm3061_vm7 = vmor %vm3059_vm6, %vm3060_vm3  ;;  %v3173_v59 = vmul.f32 8.0, %v3619_v56 }
 0xd22   : > { %v3055_v36 = vmul.f32 %v3617_v34, %v3054_v35 }
 0xd23   : > { %v3174_v62 = vsub.f32 1.0, %v3173_v59 }
 0xd24   : > { %v3056_v37 = vmul.f32 0.5, %v3055_v36 }
 0xd26   : > { %v3057_v57 = vsub.f32 1.5, %v3056_v37 }
 0xd28   : > { %v3058_v39 = vmul.f32 %v3617_v34, %v3057_v57 }
 0xd2a   : > { %v3062_v41 = vsel %vm3061_vm7, %v3617_v34, %v3058_v39 }
 0xd2b   : > { %v3063_v42 = vmul.f32 %v3062_v41, %v3046_v24 }
 0xd2d   : > { %v3068_v43 = vmul.f32 %v3571_v40, %v3063_v42 }
 0xd2f   : > { %v3073_v44 = vadd.f32 %v3572_v38, %v3068_v43 }
 0xd31   : > { %3457 = vmatmul.msk.f32.vlgmr.msrb.gmra.mxu0 %vm1511_vm4, %v3073_v44 }
 0xdae   : > { %v3102_v48 = vpop.f32.mrf.mxu0 }
 0xdaf   : > { %v3103_v49 = vadd.f32 %v3573_v47, %v3102_v48 }
 0xdb1   : > { %v3105_v50 = vmax.f32 %v3103_v49, 0.0 }
 0xdb3   : > { %3458 = vmatmul.msk.f32.vlgmr.msra.gmra.mxu2 %vm1371_vm2, %v3105_v50 }
 0xe36   : > { %v3132_v52 = vpop.f32.mrf.mxu2 }
 0xe37   : > { %v3133_v53 = vadd.f32 %v3574_v51, %v3132_v52 }
 0xe39   : > { %v3135_v54 = vmax.f32 %v3133_v53, 0.0 }
 0xe3b   : > { %3459 = vmatmul.msk.f32.vlgmr.msra.gmra.mxu3 %vm1787_vm5, %v3135_v54 }
 0xebe   : > { %v3161_v60 = vpop.f32.mrf.mxu3 }
 0xebf   : > { %v3162_v61 = vadd.f32 %v3575_v58, %v3161_v60 }
 0xec1   : > { %v3165_v63 = vsel %vm1511_vm4, %v3162_v61, 0.0  ;;  %3164 = vst.msk [vmem:[%s1343_s4] sm:$0xff] %vm1511_vm4, %v3162_v61 }
 0xec2   : > { %v3166_v0 = vrot.slane %v3165_v63, 4 }
 0xec3   : > { %3647 = shalt.err (!%p3644_p3)
}
 0xec4   : > { %3464 = dma.vmem_to_hbm [thread:$0]  (%p4031_p5), %s3200_s5, 128, %s3202_s9, %s3183_s10   ;;  %v3175_v1 = vmul.f32 %v3619_v56, %v3174_v62  ;;  %v3167_v2 = vadd.f32 %v3166_v0, %v3165_v63  ;;  %vm3177_vm2 = vweird.f32 %v3619_v56  ;;  %vm3180_vm4 = vcmask 253952  }
 0xec5   : > { %s3210_s4 = scalar_lea.hbm %s3991_s27, %s4014_s0  ;;  %s1349_s12 = scalar_lea.vmem [#allocation4], %s4360_s8 }
 0xec6   : > { %v3168_v3 = vrot.slane %v3167_v2, 2  ;;  %v3176_v4 = vadd.f32 %v3619_v56, %v3175_v1  ;;  %s3212_s16 = sshll.u32 %s1349_s12, 4  ;;  %s3214_s3 = sshll.u32 %s3210_s4, 4  ;;  %s3213_s16 = int_to_ptr.vmem [resolvable:$true] %s3212_s16  ;;  %s3215_s3 = int_to_ptr.hbm [resolvable:$true] %s3214_s3 }
 0xec7   : > { %s3188_s9 = scalar_lea.sflag [#allocation5], %s4360_s8  ;;  %s3662_s10 = sshra.s32 %s3215_s3, 4  ;;  %s3663_s10 = int_to_ptr.hbm [resolvable:$true] %s3662_s10 }
 0xec8   : > { %v3169_v22 = vadd.f32 %v3168_v3, %v3167_v2  ;;  %v3178_v7 = vsel %vm3177_vm2, %v3619_v56, %v3176_v4  ;;  %s3664_s5 = scalar_lea.hbm %s3663_s10, 1  ;;  %s3668_s0 = scalar_lea.hbm %s3991_s27, 2 }
 0xec9   : > { %p3665_p4 = scmp.ne.s32.totalorder %s3663_s10, %s3664_s5  ;;  %p3669_p9 = scmp.lt.s32.totalorder %s3663_s10, %s3991_s27 }
 0xeca   : > { %v3170_v6 = vrot.slane %v3169_v22, 1  ;;  %p3670_p10 = scmp.lt.s32.totalorder %s3668_s0, %s3664_s5 }
 0xecb   : > { %p3666_p7 = pnand %p3665_p4, %p4031_p5 }
 0xecc   : > { %v3171_v8 = vadd.f32 %v3170_v6, %v3169_v22  ;;  %p3671_p11 = por %p3670_p10, %p3669_p9 }
 0xecd   : > { %p3667_p8 = pneg %p3666_p7 }
 0xece   : > { %v3179_v9 = vmul.f32 %v3178_v7, %v3171_v8 }
 0xecf   : > { %p3672_p12 = pnand %p3671_p11, %p3667_p8 }
 0xed0   : > { %3181 = vst.msk [vmem:[%s1349_s12] sm:$0x1] %vm3180_vm4, %v3179_v9 }
 0xed1   : > { %3675 = shalt.err (!%p3672_p12)
}
 0xed2   : > { %3465 = dma.vmem_to_hbm [thread:$0]  (%p4031_p5), %s3213_s16, 16, %s3215_s3, %s3188_s9  }
 0xed3 PF: > { %p3475_p13 = scmp.ge.s32.totalorder %s3714_s7, 2  ;;  %s3226_s8 = sand.u32 1, %s3702_s28  }
 0xed4   : > { %s3227_s6 = scalar_lea.sflag [#allocation3], %s3226_s8 }
 0xed5   : > { %p3469_p0 = pnand %p3475_p13, %p4035_p6 }
 0xed7   : > { %p3470_p1 = pneg %p3469_p0 }
 0xed9   : > { %3693 = dma.done.wait (%p3470_p1), %s3227_s6, 128  }
 0xeda   : > { %3695 = vsyncadd (%p3470_p1), %s3227_s6, 4294967168  ;;  %s3237_s4 = scalar_lea.sflag [#allocation5], %s3226_s8 }
 0xedb   : > { %3697 = dma.done.wait (%p3470_p1), %s3237_s4, 16  }
 0xedc   : > { %3699 = vsyncadd (%p3470_p1), %s3237_s4, 4294967280  ;;  %p103_p5 = scmp.ge.s32.totalorder %s4018_s11, 4   ;;  %s4495_s28 = smov %s3706_s1 }
 0xedd   : > { %s4496_s1 = smov %s3710_s2  ;;  %s4497_s2 = smov %s4029_s18 }
 0xede   : > { %s4498_s7 = smov %s4018_s11  ;;  %105 = sbr.rel (!%p103_p5) target bundleno = 101 (0x65), region = 300 }
 0xee3   :  { %3242 = vsyncpa [#allocation3], 1 }
 0xee4   :  { %3244 = vsyncpa [#allocation3 + $0x1], 1 }
 0xee5   :  { %3245 = vsyncpa [#allocation5], 1 }
 0xee6   :  { %3247 = vsyncpa [#allocation5 + $0x1], 1 }

</bundles_post_ra>
